<compile_context>
chip_gen: v7x
topology: tpu7x:2x2x1
jax: 0.10.0
libtpu: 0.0.40
codegen_flags: <defaults>
</compile_context>

<pallas_src>
import jax
import jax.numpy as jnp
from jax.experimental import pallas as pl
from jax.experimental.pallas import tpu as pltpu
import numpy as np


def lstm_mlp_kernel(x_ref,        # (T*Bp, E)  time-major flattened embedded input
                    wih0_ref,     # (E, 4H)
                    b0_ref,       # (1, 4H)   folded bih_l0 + bhh_l0   (f32)
                    whh0_ref,     # (H, 4H)
                    w1_ref,       # (2H, 4H)  concat([Wih1; Whh1], axis=0)
                    b1_ref,       # (1, 4H)   folded bih_l1 + bhh_l1   (f32)
                    wfc_ref,      # (H, Cp)   folded fc1 @ fc2, lane-padded
                    bfc_ref,      # (1, Cp)   folded bias, lane-padded   (f32)
                    out_ref):     # (Bp, Cp)
    TB, _ = x_ref.shape
    H = whh0_ref.shape[0]
    Bp = out_ref.shape[0]
    T = TB // Bp
    wd = whh0_ref.dtype           # matmul-operand dtype (f32 default, bf16 knob)

    # --- pre-pass: one big matmul for the layer-0 input projection -----------
    gx0 = (jnp.dot(x_ref[...], wih0_ref[...], preferred_element_type=jnp.float32)
           + b0_ref[...])                                   # (T*Bp, 4H), f32

    whh0 = whh0_ref[...]
    w1 = w1_ref[...]
    b1 = b1_ref[...]

    # --- recurrence: state lives in vregs, loop fully unrolled ----------------
    h0 = jnp.zeros((Bp, H), jnp.float32)
    c0 = jnp.zeros((Bp, H), jnp.float32)
    h1 = jnp.zeros((Bp, H), jnp.float32)
    c1 = jnp.zeros((Bp, H), jnp.float32)

    def act(gates, c):
        # PyTorch gate order: i, f, g, o  (elementwise math kept in f32;
        # sigmoid/tanh use the EUP slot -> effectively free next to the MXU).
        i = jax.nn.sigmoid(gates[:, 0 * H:1 * H])
        f = jax.nn.sigmoid(gates[:, 1 * H:2 * H])
        g = jnp.tanh(gates[:, 2 * H:3 * H])
        o = jax.nn.sigmoid(gates[:, 3 * H:4 * H])
        c_new = f * c + i * g
        h_new = o * jnp.tanh(c_new)
        return h_new, c_new

    for t in range(T):  # T is static & small -> full unroll, LLO sees all steps
        # layer 0: only the recurrent matmul is on the serial path
        g0 = gx0[t * Bp:(t + 1) * Bp, :] + jnp.dot(
            h0.astype(wd), whh0, preferred_element_type=jnp.float32)
        h0, c0 = act(g0, c0)
        # layer 1: fused input+recurrent matmul (one MXU push)
        hh = jnp.concatenate([h0, h1], axis=1).astype(wd)    # (Bp, 2H)
        g1 = jnp.dot(hh, w1, preferred_element_type=jnp.float32) + b1
        h1, c1 = act(g1, c1)

    # --- epilogue: folded fc1+fc2 on the last hidden state of layer 1 ---------
    # out is lane-padded to Cp=128 -> unmasked full-lane store.
    out_ref[...] = (jnp.dot(h1.astype(wd), wfc_ref[...],
                            preferred_element_type=jnp.float32)
                    + bfc_ref[...]).astype(out_ref.dtype)


def stacked_lstm_forward(tokens, params, *, matmul_dtype=jnp.float32):
    """tokens: (B, T) int32. params: dict of f32 arrays. Returns (B, C) logits."""
    emb = params["embedding"]                  # (V, E)
    B, T = tokens.shape
    E = emb.shape[1]
    H = params["whh_l0"].shape[1]              # whh_l0 is (4H, H)
    C = params["fc2_w"].shape[0]

    Bp = -(-B // 8) * 8                        # pad batch to a sublane multiple
    Cp = -(-C // 128) * 128                    # pad classes to a lane multiple

    # glue: embedding gather + time-major flatten (kept out of the hot kernel)
    x = jnp.take(emb, tokens, axis=0)          # (B, T, E)
    x = jnp.transpose(x, (1, 0, 2))            # (T, B, E)
    if Bp != B:
        x = jnp.pad(x, ((0, 0), (0, Bp - B), (0, 0)))
    x = x.reshape(T * Bp, E).astype(matmul_dtype)

    # weight prep: pre-transpose to (in, out), fold biases, fuse layer-1 weights,
    # fold fc1/fc2 into a single matmul, lane-pad classifier to Cp.
    wih0 = params["wih_l0"].T.astype(matmul_dtype)                      # (E, 4H)
    b0 = (params["bih_l0"] + params["bhh_l0"]).reshape(1, -1)           # (1, 4H) f32
    whh0 = params["whh_l0"].T.astype(matmul_dtype)                      # (H, 4H)
    w1 = jnp.concatenate([params["wih_l1"].T, params["whh_l1"].T],
                         axis=0).astype(matmul_dtype)                   # (2H, 4H)
    b1 = (params["bih_l1"] + params["bhh_l1"]).reshape(1, -1)           # (1, 4H) f32
    wfc = (params["fc1_w"].T @ params["fc2_w"].T)                       # (H, C)
    bfc = (params["fc1_b"] @ params["fc2_w"].T
           + params["fc2_b"]).reshape(1, -1)                            # (1, C) f32
    if Cp != C:
        wfc = jnp.pad(wfc, ((0, 0), (0, Cp - C)))
        bfc = jnp.pad(bfc, ((0, 0), (0, Cp - C)))
    wfc = wfc.astype(matmul_dtype)                                      # (H, Cp)

    vmem = pl.BlockSpec(memory_space=pltpu.MemorySpace.VMEM)
    out = pl.pallas_call(
        lstm_mlp_kernel,
        out_shape=jax.ShapeDtypeStruct((Bp, Cp), jnp.float32),
        in_specs=[vmem] * 8,
        out_specs=vmem,
        compiler_params=pltpu.CompilerParams(vmem_limit_bytes=32 << 20),
    )(x, wih0, b0, whh0, w1, b1, wfc, bfc)
    return out[:B, :C]


def reference_forward(tokens, params):
    """Pure-JAX reference mirroring the PyTorch module."""
    x = jnp.take(params["embedding"], tokens, axis=0)   # (B, T, E)
    B, T, _ = x.shape
    H = params["whh_l0"].shape[1]

    def cell(xt, h, c, wih, whh, bih, bhh):
        gates = xt @ wih.T + bih + h @ whh.T + bhh
        i, f, g, o = jnp.split(gates, 4, axis=-1)
        c_new = jax.nn.sigmoid(f) * c + jax.nn.sigmoid(i) * jnp.tanh(g)
        h_new = jax.nn.sigmoid(o) * jnp.tanh(c_new)
        return h_new, c_new

    h0 = c0 = h1 = c1 = jnp.zeros((B, H), jnp.float32)
    for t in range(T):
        h0, c0 = cell(x[:, t, :], h0, c0, params["wih_l0"], params["whh_l0"],
                      params["bih_l0"], params["bhh_l0"])
        h1, c1 = cell(h0, h1, c1, params["wih_l1"], params["whh_l1"],
                      params["bih_l1"], params["bhh_l1"])
    feat = h1 @ params["fc1_w"].T + params["fc1_b"]
    return feat @ params["fc2_w"].T + params["fc2_b"]


def make_params(key, vocab, emb_dim, n_hidden, num_classes):
    ks = jax.random.split(key, 12)
    s = 0.1
    return {
        "embedding": jax.random.normal(ks[0], (vocab, emb_dim), jnp.float32) * s,
        "wih_l0": jax.random.normal(ks[1], (4 * n_hidden, emb_dim), jnp.float32) * s,
        "whh_l0": jax.random.normal(ks[2], (4 * n_hidden, n_hidden), jnp.float32) * s,
        "bih_l0": jax.random.normal(ks[3], (4 * n_hidden,), jnp.float32) * s,
        "bhh_l0": jax.random.normal(ks[4], (4 * n_hidden,), jnp.float32) * s,
        "wih_l1": jax.random.normal(ks[5], (4 * n_hidden, n_hidden), jnp.float32) * s,
        "whh_l1": jax.random.normal(ks[6], (4 * n_hidden, n_hidden), jnp.float32) * s,
        "bih_l1": jax.random.normal(ks[7], (4 * n_hidden,), jnp.float32) * s,
        "bhh_l1": jax.random.normal(ks[8], (4 * n_hidden,), jnp.float32) * s,
        "fc1_w": jax.random.normal(ks[9], (128, n_hidden), jnp.float32) * s,
        "fc1_b": jnp.zeros((128,), jnp.float32),
        "fc2_w": jax.random.normal(ks[10], (num_classes, 128), jnp.float32) * s,
        "fc2_b": jnp.zeros((num_classes,), jnp.float32),
    }


if __name__ == "__main__":
    # small shapes consistent with the module: seq_len=8, embedding_dim=32,
    # n_hidden=32, num_classes=2, batch=2, synthetic vocab=64
    B, T, E, H, C, V = 2, 8, 32, 32, 2, 64

    key = jax.random.PRNGKey(0)
    k_tok, k_par = jax.random.split(key)
    tokens = jax.random.randint(k_tok, (B, T), 0, V, dtype=jnp.int32)
    params = make_params(k_par, V, E, H, C)

    out = stacked_lstm_forward(tokens, params)
    out = jax.block_until_ready(out)

    ref = reference_forward(tokens, params)
    np.testing.assert_allclose(np.asarray(out), np.asarray(ref), rtol=1e-4, atol=1e-5)

    print("KERNEL_OK")
</pallas_src>

<mosaic_0001>
module attributes {stable_mosaic.version = 11 : i64} {
  func.func @lstm_mlp_kernel(%arg0: memref<64x32xf32, #tpu.memory_space<vmem>>, %arg1: memref<32x128xf32, #tpu.memory_space<vmem>>, %arg2: memref<1x128xf32, #tpu.memory_space<vmem>>, %arg3: memref<32x128xf32, #tpu.memory_space<vmem>>, %arg4: memref<64x128xf32, #tpu.memory_space<vmem>>, %arg5: memref<1x128xf32, #tpu.memory_space<vmem>>, %arg6: memref<32x128xf32, #tpu.memory_space<vmem>>, %arg7: memref<1x128xf32, #tpu.memory_space<vmem>>, %arg8: memref<8x128xf32, #tpu.memory_space<vmem>>) attributes {dimension_semantics = [], scalar_prefetch = 0 : i64, scratch_operands = 0 : i64, tpu.core_type = #tpu.core_type<tc>} {
    %c0 = arith.constant 0 : index
    %c0_0 = arith.constant 0 : index
    %0 = vector.load %arg0[%c0, %c0_0] : memref<64x32xf32, #tpu.memory_space<vmem>>, vector<64x32xf32>
    %c0_1 = arith.constant 0 : index
    %c0_2 = arith.constant 0 : index
    %1 = vector.load %arg1[%c0_1, %c0_2] : memref<32x128xf32, #tpu.memory_space<vmem>>, vector<32x128xf32>
    %cst = arith.constant dense<0.000000e+00> : vector<64x128xf32>
    %2 = tpu.matmul %0, %1, %cst {dimension_numbers = #tpu.dot_dimension_numbers<[1], [0], [0], [1], [0, 0, 1, 1], [], []>} : vector<64x32xf32>, vector<32x128xf32>, vector<64x128xf32> -> vector<64x128xf32>
    %c0_3 = arith.constant 0 : index
    %c0_4 = arith.constant 0 : index
    %3 = vector.load %arg2[%c0_3, %c0_4] : memref<1x128xf32, #tpu.memory_space<vmem>>, vector<1x128xf32>
    %4 = vector.broadcast %3 : vector<1x128xf32> to vector<64x128xf32>
    %5 = arith.addf %2, %4 : vector<64x128xf32>
    %c0_5 = arith.constant 0 : index
    %c0_6 = arith.constant 0 : index
    %6 = vector.load %arg3[%c0_5, %c0_6] : memref<32x128xf32, #tpu.memory_space<vmem>>, vector<32x128xf32>
    %c0_7 = arith.constant 0 : index
    %c0_8 = arith.constant 0 : index
    %7 = vector.load %arg4[%c0_7, %c0_8] : memref<64x128xf32, #tpu.memory_space<vmem>>, vector<64x128xf32>
    %c0_9 = arith.constant 0 : index
    %c0_10 = arith.constant 0 : index
    %8 = vector.load %arg5[%c0_9, %c0_10] : memref<1x128xf32, #tpu.memory_space<vmem>>, vector<1x128xf32>
    %cst_11 = arith.constant 0.000000e+00 : f32
    %9 = vector.broadcast %cst_11 : f32 to vector<8x32xf32>
    %cst_12 = arith.constant 0.000000e+00 : f32
    %10 = vector.broadcast %cst_12 : f32 to vector<8x32xf32>
    %cst_13 = arith.constant 0.000000e+00 : f32
    %11 = vector.broadcast %cst_13 : f32 to vector<8x32xf32>
    %cst_14 = arith.constant 0.000000e+00 : f32
    %12 = vector.broadcast %cst_14 : f32 to vector<8x32xf32>
    %13 = vector.extract_strided_slice %5 {offsets = [0, 0], sizes = [8, 128], strides = [1, 1]} : vector<64x128xf32> to vector<8x128xf32>
    %cst_15 = arith.constant dense<0.000000e+00> : vector<8x128xf32>
    %14 = tpu.matmul %9, %6, %cst_15 {dimension_numbers = #tpu.dot_dimension_numbers<[1], [0], [0], [1], [0, 0, 1, 1], [], []>} : vector<8x32xf32>, vector<32x128xf32>, vector<8x128xf32> -> vector<8x128xf32>
    %15 = arith.addf %13, %14 : vector<8x128xf32>
    %16 = vector.extract_strided_slice %15 {offsets = [0, 0], sizes = [8, 32], strides = [1, 1]} : vector<8x128xf32> to vector<8x32xf32>
    %17 = arith.negf %16 : vector<8x32xf32>
    %18 = math.exp %17 : vector<8x32xf32>
    %cst_16 = arith.constant 1.000000e+00 : f32
    %19 = vector.broadcast %cst_16 : f32 to vector<8x32xf32>
    %20 = arith.addf %19, %18 : vector<8x32xf32>
    %21 = arith.divf %19, %20 : vector<8x32xf32>
    %22 = vector.extract_strided_slice %15 {offsets = [0, 32], sizes = [8, 32], strides = [1, 1]} : vector<8x128xf32> to vector<8x32xf32>
    %23 = arith.negf %22 : vector<8x32xf32>
    %24 = math.exp %23 : vector<8x32xf32>
    %cst_17 = arith.constant 1.000000e+00 : f32
    %25 = vector.broadcast %cst_17 : f32 to vector<8x32xf32>
    %26 = arith.addf %25, %24 : vector<8x32xf32>
    %27 = arith.divf %25, %26 : vector<8x32xf32>
    %28 = vector.extract_strided_slice %15 {offsets = [0, 64], sizes = [8, 32], strides = [1, 1]} : vector<8x128xf32> to vector<8x32xf32>
    %29 = math.tanh %28 : vector<8x32xf32>
    %30 = vector.extract_strided_slice %15 {offsets = [0, 96], sizes = [8, 32], strides = [1, 1]} : vector<8x128xf32> to vector<8x32xf32>
    %31 = arith.negf %30 : vector<8x32xf32>
    %32 = math.exp %31 : vector<8x32xf32>
    %cst_18 = arith.constant 1.000000e+00 : f32
    %33 = vector.broadcast %cst_18 : f32 to vector<8x32xf32>
    %34 = arith.addf %33, %32 : vector<8x32xf32>
    %35 = arith.divf %33, %34 : vector<8x32xf32>
    %36 = arith.mulf %27, %10 : vector<8x32xf32>
    %37 = arith.mulf %21, %29 : vector<8x32xf32>
    %38 = arith.addf %36, %37 : vector<8x32xf32>
    %39 = math.tanh %38 : vector<8x32xf32>
    %40 = arith.mulf %35, %39 : vector<8x32xf32>
    %41 = tpu.concatenate %40, %11 in 1 : vector<8x32xf32>, vector<8x32xf32> -> vector<8x64xf32>
    %cst_19 = arith.constant dense<0.000000e+00> : vector<8x128xf32>
    %42 = tpu.matmul %41, %7, %cst_19 {dimension_numbers = #tpu.dot_dimension_numbers<[1], [0], [0], [1], [0, 0, 1, 1], [], []>} : vector<8x64xf32>, vector<64x128xf32>, vector<8x128xf32> -> vector<8x128xf32>
    %43 = vector.broadcast %8 : vector<1x128xf32> to vector<8x128xf32>
    %44 = arith.addf %42, %43 : vector<8x128xf32>
    %45 = vector.extract_strided_slice %44 {offsets = [0, 0], sizes = [8, 32], strides = [1, 1]} : vector<8x128xf32> to vector<8x32xf32>
    %46 = arith.negf %45 : vector<8x32xf32>
    %47 = math.exp %46 : vector<8x32xf32>
    %cst_20 = arith.constant 1.000000e+00 : f32
    %48 = vector.broadcast %cst_20 : f32 to vector<8x32xf32>
    %49 = arith.addf %48, %47 : vector<8x32xf32>
    %50 = arith.divf %48, %49 : vector<8x32xf32>
    %51 = vector.extract_strided_slice %44 {offsets = [0, 32], sizes = [8, 32], strides = [1, 1]} : vector<8x128xf32> to vector<8x32xf32>
    %52 = arith.negf %51 : vector<8x32xf32>
    %53 = math.exp %52 : vector<8x32xf32>
    %cst_21 = arith.constant 1.000000e+00 : f32
    %54 = vector.broadcast %cst_21 : f32 to vector<8x32xf32>
    %55 = arith.addf %54, %53 : vector<8x32xf32>
    %56 = arith.divf %54, %55 : vector<8x32xf32>
    %57 = vector.extract_strided_slice %44 {offsets = [0, 64], sizes = [8, 32], strides = [1, 1]} : vector<8x128xf32> to vector<8x32xf32>
    %58 = math.tanh %57 : vector<8x32xf32>
    %59 = vector.extract_strided_slice %44 {offsets = [0, 96], sizes = [8, 32], strides = [1, 1]} : vector<8x128xf32> to vector<8x32xf32>
    %60 = arith.negf %59 : vector<8x32xf32>
    %61 = math.exp %60 : vector<8x32xf32>
    %cst_22 = arith.constant 1.000000e+00 : f32
    %62 = vector.broadcast %cst_22 : f32 to vector<8x32xf32>
    %63 = arith.addf %62, %61 : vector<8x32xf32>
    %64 = arith.divf %62, %63 : vector<8x32xf32>
    %65 = arith.mulf %56, %12 : vector<8x32xf32>
    %66 = arith.mulf %50, %58 : vector<8x32xf32>
    %67 = arith.addf %65, %66 : vector<8x32xf32>
    %68 = math.tanh %67 : vector<8x32xf32>
    %69 = arith.mulf %64, %68 : vector<8x32xf32>
    %70 = vector.extract_strided_slice %5 {offsets = [8, 0], sizes = [8, 128], strides = [1, 1]} : vector<64x128xf32> to vector<8x128xf32>
    %cst_23 = arith.constant dense<0.000000e+00> : vector<8x128xf32>
    %71 = tpu.matmul %40, %6, %cst_23 {dimension_numbers = #tpu.dot_dimension_numbers<[1], [0], [0], [1], [0, 0, 1, 1], [], []>} : vector<8x32xf32>, vector<32x128xf32>, vector<8x128xf32> -> vector<8x128xf32>
    %72 = arith.addf %70, %71 : vector<8x128xf32>
    %73 = vector.extract_strided_slice %72 {offsets = [0, 0], sizes = [8, 32], strides = [1, 1]} : vector<8x128xf32> to vector<8x32xf32>
    %74 = arith.negf %73 : vector<8x32xf32>
    %75 = math.exp %74 : vector<8x32xf32>
    %cst_24 = arith.constant 1.000000e+00 : f32
    %76 = vector.broadcast %cst_24 : f32 to vector<8x32xf32>
    %77 = arith.addf %76, %75 : vector<8x32xf32>
    %78 = arith.divf %76, %77 : vector<8x32xf32>
    %79 = vector.extract_strided_slice %72 {offsets = [0, 32], sizes = [8, 32], strides = [1, 1]} : vector<8x128xf32> to vector<8x32xf32>
    %80 = arith.negf %79 : vector<8x32xf32>
    %81 = math.exp %80 : vector<8x32xf32>
    %cst_25 = arith.constant 1.000000e+00 : f32
    %82 = vector.broadcast %cst_25 : f32 to vector<8x32xf32>
    %83 = arith.addf %82, %81 : vector<8x32xf32>
    %84 = arith.divf %82, %83 : vector<8x32xf32>
    %85 = vector.extract_strided_slice %72 {offsets = [0, 64], sizes = [8, 32], strides = [1, 1]} : vector<8x128xf32> to vector<8x32xf32>
    %86 = math.tanh %85 : vector<8x32xf32>
    %87 = vector.extract_strided_slice %72 {offsets = [0, 96], sizes = [8, 32], strides = [1, 1]} : vector<8x128xf32> to vector<8x32xf32>
    %88 = arith.negf %87 : vector<8x32xf32>
    %89 = math.exp %88 : vector<8x32xf32>
    %cst_26 = arith.constant 1.000000e+00 : f32
    %90 = vector.broadcast %cst_26 : f32 to vector<8x32xf32>
    %91 = arith.addf %90, %89 : vector<8x32xf32>
    %92 = arith.divf %90, %91 : vector<8x32xf32>
    %93 = arith.mulf %84, %38 : vector<8x32xf32>
    %94 = arith.mulf %78, %86 : vector<8x32xf32>
    %95 = arith.addf %93, %94 : vector<8x32xf32>
    %96 = math.tanh %95 : vector<8x32xf32>
    %97 = arith.mulf %92, %96 : vector<8x32xf32>
    %98 = tpu.concatenate %97, %69 in 1 : vector<8x32xf32>, vector<8x32xf32> -> vector<8x64xf32>
    %cst_27 = arith.constant dense<0.000000e+00> : vector<8x128xf32>
    %99 = tpu.matmul %98, %7, %cst_27 {dimension_numbers = #tpu.dot_dimension_numbers<[1], [0], [0], [1], [0, 0, 1, 1], [], []>} : vector<8x64xf32>, vector<64x128xf32>, vector<8x128xf32> -> vector<8x128xf32>
    %100 = vector.broadcast %8 : vector<1x128xf32> to vector<8x128xf32>
    %101 = arith.addf %99, %100 : vector<8x128xf32>
    %102 = vector.extract_strided_slice %101 {offsets = [0, 0], sizes = [8, 32], strides = [1, 1]} : vector<8x128xf32> to vector<8x32xf32>
    %103 = arith.negf %102 : vector<8x32xf32>
    %104 = math.exp %103 : vector<8x32xf32>
    %cst_28 = arith.constant 1.000000e+00 : f32
    %105 = vector.broadcast %cst_28 : f32 to vector<8x32xf32>
    %106 = arith.addf %105, %104 : vector<8x32xf32>
    %107 = arith.divf %105, %106 : vector<8x32xf32>
    %108 = vector.extract_strided_slice %101 {offsets = [0, 32], sizes = [8, 32], strides = [1, 1]} : vector<8x128xf32> to vector<8x32xf32>
    %109 = arith.negf %108 : vector<8x32xf32>
    %110 = math.exp %109 : vector<8x32xf32>
    %cst_29 = arith.constant 1.000000e+00 : f32
    %111 = vector.broadcast %cst_29 : f32 to vector<8x32xf32>
    %112 = arith.addf %111, %110 : vector<8x32xf32>
    %113 = arith.divf %111, %112 : vector<8x32xf32>
    %114 = vector.extract_strided_slice %101 {offsets = [0, 64], sizes = [8, 32], strides = [1, 1]} : vector<8x128xf32> to vector<8x32xf32>
    %115 = math.tanh %114 : vector<8x32xf32>
    %116 = vector.extract_strided_slice %101 {offsets = [0, 96], sizes = [8, 32], strides = [1, 1]} : vector<8x128xf32> to vector<8x32xf32>
    %117 = arith.negf %116 : vector<8x32xf32>
    %118 = math.exp %117 : vector<8x32xf32>
    %cst_30 = arith.constant 1.000000e+00 : f32
    %119 = vector.broadcast %cst_30 : f32 to vector<8x32xf32>
    %120 = arith.addf %119, %118 : vector<8x32xf32>
    %121 = arith.divf %119, %120 : vector<8x32xf32>
    %122 = arith.mulf %113, %67 : vector<8x32xf32>
    %123 = arith.mulf %107, %115 : vector<8x32xf32>
    %124 = arith.addf %122, %123 : vector<8x32xf32>
    %125 = math.tanh %124 : vector<8x32xf32>
    %126 = arith.mulf %121, %125 : vector<8x32xf32>
    %127 = vector.extract_strided_slice %5 {offsets = [16, 0], sizes = [8, 128], strides = [1, 1]} : vector<64x128xf32> to vector<8x128xf32>
    %cst_31 = arith.constant dense<0.000000e+00> : vector<8x128xf32>
    %128 = tpu.matmul %97, %6, %cst_31 {dimension_numbers = #tpu.dot_dimension_numbers<[1], [0], [0], [1], [0, 0, 1, 1], [], []>} : vector<8x32xf32>, vector<32x128xf32>, vector<8x128xf32> -> vector<8x128xf32>
    %129 = arith.addf %127, %128 : vector<8x128xf32>
    %130 = vector.extract_strided_slice %129 {offsets = [0, 0], sizes = [8, 32], strides = [1, 1]} : vector<8x128xf32> to vector<8x32xf32>
    %131 = arith.negf %130 : vector<8x32xf32>
    %132 = math.exp %131 : vector<8x32xf32>
    %cst_32 = arith.constant 1.000000e+00 : f32
    %133 = vector.broadcast %cst_32 : f32 to vector<8x32xf32>
    %134 = arith.addf %133, %132 : vector<8x32xf32>
    %135 = arith.divf %133, %134 : vector<8x32xf32>
    %136 = vector.extract_strided_slice %129 {offsets = [0, 32], sizes = [8, 32], strides = [1, 1]} : vector<8x128xf32> to vector<8x32xf32>
    %137 = arith.negf %136 : vector<8x32xf32>
    %138 = math.exp %137 : vector<8x32xf32>
    %cst_33 = arith.constant 1.000000e+00 : f32
    %139 = vector.broadcast %cst_33 : f32 to vector<8x32xf32>
    %140 = arith.addf %139, %138 : vector<8x32xf32>
    %141 = arith.divf %139, %140 : vector<8x32xf32>
    %142 = vector.extract_strided_slice %129 {offsets = [0, 64], sizes = [8, 32], strides = [1, 1]} : vector<8x128xf32> to vector<8x32xf32>
    %143 = math.tanh %142 : vector<8x32xf32>
    %144 = vector.extract_strided_slice %129 {offsets = [0, 96], sizes = [8, 32], strides = [1, 1]} : vector<8x128xf32> to vector<8x32xf32>
    %145 = arith.negf %144 : vector<8x32xf32>
    %146 = math.exp %145 : vector<8x32xf32>
    %cst_34 = arith.constant 1.000000e+00 : f32
    %147 = vector.broadcast %cst_34 : f32 to vector<8x32xf32>
    %148 = arith.addf %147, %146 : vector<8x32xf32>
    %149 = arith.divf %147, %148 : vector<8x32xf32>
    %150 = arith.mulf %141, %95 : vector<8x32xf32>
    %151 = arith.mulf %135, %143 : vector<8x32xf32>
    %152 = arith.addf %150, %151 : vector<8x32xf32>
    %153 = math.tanh %152 : vector<8x32xf32>
    %154 = arith.mulf %149, %153 : vector<8x32xf32>
    %155 = tpu.concatenate %154, %126 in 1 : vector<8x32xf32>, vector<8x32xf32> -> vector<8x64xf32>
    %cst_35 = arith.constant dense<0.000000e+00> : vector<8x128xf32>
    %156 = tpu.matmul %155, %7, %cst_35 {dimension_numbers = #tpu.dot_dimension_numbers<[1], [0], [0], [1], [0, 0, 1, 1], [], []>} : vector<8x64xf32>, vector<64x128xf32>, vector<8x128xf32> -> vector<8x128xf32>
    %157 = vector.broadcast %8 : vector<1x128xf32> to vector<8x128xf32>
    %158 = arith.addf %156, %157 : vector<8x128xf32>
    %159 = vector.extract_strided_slice %158 {offsets = [0, 0], sizes = [8, 32], strides = [1, 1]} : vector<8x128xf32> to vector<8x32xf32>
    %160 = arith.negf %159 : vector<8x32xf32>
    %161 = math.exp %160 : vector<8x32xf32>
    %cst_36 = arith.constant 1.000000e+00 : f32
    %162 = vector.broadcast %cst_36 : f32 to vector<8x32xf32>
    %163 = arith.addf %162, %161 : vector<8x32xf32>
    %164 = arith.divf %162, %163 : vector<8x32xf32>
    %165 = vector.extract_strided_slice %158 {offsets = [0, 32], sizes = [8, 32], strides = [1, 1]} : vector<8x128xf32> to vector<8x32xf32>
    %166 = arith.negf %165 : vector<8x32xf32>
    %167 = math.exp %166 : vector<8x32xf32>
    %cst_37 = arith.constant 1.000000e+00 : f32
    %168 = vector.broadcast %cst_37 : f32 to vector<8x32xf32>
    %169 = arith.addf %168, %167 : vector<8x32xf32>
    %170 = arith.divf %168, %169 : vector<8x32xf32>
    %171 = vector.extract_strided_slice %158 {offsets = [0, 64], sizes = [8, 32], strides = [1, 1]} : vector<8x128xf32> to vector<8x32xf32>
    %172 = math.tanh %171 : vector<8x32xf32>
    %173 = vector.extract_strided_slice %158 {offsets = [0, 96], sizes = [8, 32], strides = [1, 1]} : vector<8x128xf32> to vector<8x32xf32>
    %174 = arith.negf %173 : vector<8x32xf32>
    %175 = math.exp %174 : vector<8x32xf32>
    %cst_38 = arith.constant 1.000000e+00 : f32
    %176 = vector.broadcast %cst_38 : f32 to vector<8x32xf32>
    %177 = arith.addf %176, %175 : vector<8x32xf32>
    %178 = arith.divf %176, %177 : vector<8x32xf32>
    %179 = arith.mulf %170, %124 : vector<8x32xf32>
    %180 = arith.mulf %164, %172 : vector<8x32xf32>
    %181 = arith.addf %179, %180 : vector<8x32xf32>
    %182 = math.tanh %181 : vector<8x32xf32>
    %183 = arith.mulf %178, %182 : vector<8x32xf32>
    %184 = vector.extract_strided_slice %5 {offsets = [24, 0], sizes = [8, 128], strides = [1, 1]} : vector<64x128xf32> to vector<8x128xf32>
    %cst_39 = arith.constant dense<0.000000e+00> : vector<8x128xf32>
    %185 = tpu.matmul %154, %6, %cst_39 {dimension_numbers = #tpu.dot_dimension_numbers<[1], [0], [0], [1], [0, 0, 1, 1], [], []>} : vector<8x32xf32>, vector<32x128xf32>, vector<8x128xf32> -> vector<8x128xf32>
    %186 = arith.addf %184, %185 : vector<8x128xf32>
    %187 = vector.extract_strided_slice %186 {offsets = [0, 0], sizes = [8, 32], strides = [1, 1]} : vector<8x128xf32> to vector<8x32xf32>
    %188 = arith.negf %187 : vector<8x32xf32>
    %189 = math.exp %188 : vector<8x32xf32>
    %cst_40 = arith.constant 1.000000e+00 : f32
    %190 = vector.broadcast %cst_40 : f32 to vector<8x32xf32>
    %191 = arith.addf %190, %189 : vector<8x32xf32>
    %192 = arith.divf %190, %191 : vector<8x32xf32>
    %193 = vector.extract_strided_slice %186 {offsets = [0, 32], sizes = [8, 32], strides = [1, 1]} : vector<8x128xf32> to vector<8x32xf32>
    %194 = arith.negf %193 : vector<8x32xf32>
    %195 = math.exp %194 : vector<8x32xf32>
    %cst_41 = arith.constant 1.000000e+00 : f32
    %196 = vector.broadcast %cst_41 : f32 to vector<8x32xf32>
    %197 = arith.addf %196, %195 : vector<8x32xf32>
    %198 = arith.divf %196, %197 : vector<8x32xf32>
    %199 = vector.extract_strided_slice %186 {offsets = [0, 64], sizes = [8, 32], strides = [1, 1]} : vector<8x128xf32> to vector<8x32xf32>
    %200 = math.tanh %199 : vector<8x32xf32>
    %201 = vector.extract_strided_slice %186 {offsets = [0, 96], sizes = [8, 32], strides = [1, 1]} : vector<8x128xf32> to vector<8x32xf32>
    %202 = arith.negf %201 : vector<8x32xf32>
    %203 = math.exp %202 : vector<8x32xf32>
    %cst_42 = arith.constant 1.000000e+00 : f32
    %204 = vector.broadcast %cst_42 : f32 to vector<8x32xf32>
    %205 = arith.addf %204, %203 : vector<8x32xf32>
    %206 = arith.divf %204, %205 : vector<8x32xf32>
    %207 = arith.mulf %198, %152 : vector<8x32xf32>
    %208 = arith.mulf %192, %200 : vector<8x32xf32>
    %209 = arith.addf %207, %208 : vector<8x32xf32>
    %210 = math.tanh %209 : vector<8x32xf32>
    %211 = arith.mulf %206, %210 : vector<8x32xf32>
    %212 = tpu.concatenate %211, %183 in 1 : vector<8x32xf32>, vector<8x32xf32> -> vector<8x64xf32>
    %cst_43 = arith.constant dense<0.000000e+00> : vector<8x128xf32>
    %213 = tpu.matmul %212, %7, %cst_43 {dimension_numbers = #tpu.dot_dimension_numbers<[1], [0], [0], [1], [0, 0, 1, 1], [], []>} : vector<8x64xf32>, vector<64x128xf32>, vector<8x128xf32> -> vector<8x128xf32>
    %214 = vector.broadcast %8 : vector<1x128xf32> to vector<8x128xf32>
    %215 = arith.addf %213, %214 : vector<8x128xf32>
    %216 = vector.extract_strided_slice %215 {offsets = [0, 0], sizes = [8, 32], strides = [1, 1]} : vector<8x128xf32> to vector<8x32xf32>
    %217 = arith.negf %216 : vector<8x32xf32>
    %218 = math.exp %217 : vector<8x32xf32>
    %cst_44 = arith.constant 1.000000e+00 : f32
    %219 = vector.broadcast %cst_44 : f32 to vector<8x32xf32>
    %220 = arith.addf %219, %218 : vector<8x32xf32>
    %221 = arith.divf %219, %220 : vector<8x32xf32>
    %222 = vector.extract_strided_slice %215 {offsets = [0, 32], sizes = [8, 32], strides = [1, 1]} : vector<8x128xf32> to vector<8x32xf32>
    %223 = arith.negf %222 : vector<8x32xf32>
    %224 = math.exp %223 : vector<8x32xf32>
    %cst_45 = arith.constant 1.000000e+00 : f32
    %225 = vector.broadcast %cst_45 : f32 to vector<8x32xf32>
    %226 = arith.addf %225, %224 : vector<8x32xf32>
    %227 = arith.divf %225, %226 : vector<8x32xf32>
    %228 = vector.extract_strided_slice %215 {offsets = [0, 64], sizes = [8, 32], strides = [1, 1]} : vector<8x128xf32> to vector<8x32xf32>
    %229 = math.tanh %228 : vector<8x32xf32>
    %230 = vector.extract_strided_slice %215 {offsets = [0, 96], sizes = [8, 32], strides = [1, 1]} : vector<8x128xf32> to vector<8x32xf32>
    %231 = arith.negf %230 : vector<8x32xf32>
    %232 = math.exp %231 : vector<8x32xf32>
    %cst_46 = arith.constant 1.000000e+00 : f32
    %233 = vector.broadcast %cst_46 : f32 to vector<8x32xf32>
    %234 = arith.addf %233, %232 : vector<8x32xf32>
    %235 = arith.divf %233, %234 : vector<8x32xf32>
    %236 = arith.mulf %227, %181 : vector<8x32xf32>
    %237 = arith.mulf %221, %229 : vector<8x32xf32>
    %238 = arith.addf %236, %237 : vector<8x32xf32>
    %239 = math.tanh %238 : vector<8x32xf32>
    %240 = arith.mulf %235, %239 : vector<8x32xf32>
    %241 = vector.extract_strided_slice %5 {offsets = [32, 0], sizes = [8, 128], strides = [1, 1]} : vector<64x128xf32> to vector<8x128xf32>
    %cst_47 = arith.constant dense<0.000000e+00> : vector<8x128xf32>
    %242 = tpu.matmul %211, %6, %cst_47 {dimension_numbers = #tpu.dot_dimension_numbers<[1], [0], [0], [1], [0, 0, 1, 1], [], []>} : vector<8x32xf32>, vector<32x128xf32>, vector<8x128xf32> -> vector<8x128xf32>
    %243 = arith.addf %241, %242 : vector<8x128xf32>
    %244 = vector.extract_strided_slice %243 {offsets = [0, 0], sizes = [8, 32], strides = [1, 1]} : vector<8x128xf32> to vector<8x32xf32>
    %245 = arith.negf %244 : vector<8x32xf32>
    %246 = math.exp %245 : vector<8x32xf32>
    %cst_48 = arith.constant 1.000000e+00 : f32
    %247 = vector.broadcast %cst_48 : f32 to vector<8x32xf32>
    %248 = arith.addf %247, %246 : vector<8x32xf32>
    %249 = arith.divf %247, %248 : vector<8x32xf32>
    %250 = vector.extract_strided_slice %243 {offsets = [0, 32], sizes = [8, 32], strides = [1, 1]} : vector<8x128xf32> to vector<8x32xf32>
    %251 = arith.negf %250 : vector<8x32xf32>
    %252 = math.exp %251 : vector<8x32xf32>
    %cst_49 = arith.constant 1.000000e+00 : f32
    %253 = vector.broadcast %cst_49 : f32 to vector<8x32xf32>
    %254 = arith.addf %253, %252 : vector<8x32xf32>
    %255 = arith.divf %253, %254 : vector<8x32xf32>
    %256 = vector.extract_strided_slice %243 {offsets = [0, 64], sizes = [8, 32], strides = [1, 1]} : vector<8x128xf32> to vector<8x32xf32>
    %257 = math.tanh %256 : vector<8x32xf32>
    %258 = vector.extract_strided_slice %243 {offsets = [0, 96], sizes = [8, 32], strides = [1, 1]} : vector<8x128xf32> to vector<8x32xf32>
    %259 = arith.negf %258 : vector<8x32xf32>
    %260 = math.exp %259 : vector<8x32xf32>
    %cst_50 = arith.constant 1.000000e+00 : f32
    %261 = vector.broadcast %cst_50 : f32 to vector<8x32xf32>
    %262 = arith.addf %261, %260 : vector<8x32xf32>
    %263 = arith.divf %261, %262 : vector<8x32xf32>
    %264 = arith.mulf %255, %209 : vector<8x32xf32>
    %265 = arith.mulf %249, %257 : vector<8x32xf32>
    %266 = arith.addf %264, %265 : vector<8x32xf32>
    %267 = math.tanh %266 : vector<8x32xf32>
    %268 = arith.mulf %263, %267 : vector<8x32xf32>
    %269 = tpu.concatenate %268, %240 in 1 : vector<8x32xf32>, vector<8x32xf32> -> vector<8x64xf32>
    %cst_51 = arith.constant dense<0.000000e+00> : vector<8x128xf32>
    %270 = tpu.matmul %269, %7, %cst_51 {dimension_numbers = #tpu.dot_dimension_numbers<[1], [0], [0], [1], [0, 0, 1, 1], [], []>} : vector<8x64xf32>, vector<64x128xf32>, vector<8x128xf32> -> vector<8x128xf32>
    %271 = vector.broadcast %8 : vector<1x128xf32> to vector<8x128xf32>
    %272 = arith.addf %270, %271 : vector<8x128xf32>
    %273 = vector.extract_strided_slice %272 {offsets = [0, 0], sizes = [8, 32], strides = [1, 1]} : vector<8x128xf32> to vector<8x32xf32>
    %274 = arith.negf %273 : vector<8x32xf32>
    %275 = math.exp %274 : vector<8x32xf32>
    %cst_52 = arith.constant 1.000000e+00 : f32
    %276 = vector.broadcast %cst_52 : f32 to vector<8x32xf32>
    %277 = arith.addf %276, %275 : vector<8x32xf32>
    %278 = arith.divf %276, %277 : vector<8x32xf32>
    %279 = vector.extract_strided_slice %272 {offsets = [0, 32], sizes = [8, 32], strides = [1, 1]} : vector<8x128xf32> to vector<8x32xf32>
    %280 = arith.negf %279 : vector<8x32xf32>
    %281 = math.exp %280 : vector<8x32xf32>
    %cst_53 = arith.constant 1.000000e+00 : f32
    %282 = vector.broadcast %cst_53 : f32 to vector<8x32xf32>
    %283 = arith.addf %282, %281 : vector<8x32xf32>
    %284 = arith.divf %282, %283 : vector<8x32xf32>
    %285 = vector.extract_strided_slice %272 {offsets = [0, 64], sizes = [8, 32], strides = [1, 1]} : vector<8x128xf32> to vector<8x32xf32>
    %286 = math.tanh %285 : vector<8x32xf32>
    %287 = vector.extract_strided_slice %272 {offsets = [0, 96], sizes = [8, 32], strides = [1, 1]} : vector<8x128xf32> to vector<8x32xf32>
    %288 = arith.negf %287 : vector<8x32xf32>
    %289 = math.exp %288 : vector<8x32xf32>
    %cst_54 = arith.constant 1.000000e+00 : f32
    %290 = vector.broadcast %cst_54 : f32 to vector<8x32xf32>
    %291 = arith.addf %290, %289 : vector<8x32xf32>
    %292 = arith.divf %290, %291 : vector<8x32xf32>
    %293 = arith.mulf %284, %238 : vector<8x32xf32>
    %294 = arith.mulf %278, %286 : vector<8x32xf32>
    %295 = arith.addf %293, %294 : vector<8x32xf32>
    %296 = math.tanh %295 : vector<8x32xf32>
    %297 = arith.mulf %292, %296 : vector<8x32xf32>
    %298 = vector.extract_strided_slice %5 {offsets = [40, 0], sizes = [8, 128], strides = [1, 1]} : vector<64x128xf32> to vector<8x128xf32>
    %cst_55 = arith.constant dense<0.000000e+00> : vector<8x128xf32>
    %299 = tpu.matmul %268, %6, %cst_55 {dimension_numbers = #tpu.dot_dimension_numbers<[1], [0], [0], [1], [0, 0, 1, 1], [], []>} : vector<8x32xf32>, vector<32x128xf32>, vector<8x128xf32> -> vector<8x128xf32>
    %300 = arith.addf %298, %299 : vector<8x128xf32>
    %301 = vector.extract_strided_slice %300 {offsets = [0, 0], sizes = [8, 32], strides = [1, 1]} : vector<8x128xf32> to vector<8x32xf32>
    %302 = arith.negf %301 : vector<8x32xf32>
    %303 = math.exp %302 : vector<8x32xf32>
    %cst_56 = arith.constant 1.000000e+00 : f32
    %304 = vector.broadcast %cst_56 : f32 to vector<8x32xf32>
    %305 = arith.addf %304, %303 : vector<8x32xf32>
    %306 = arith.divf %304, %305 : vector<8x32xf32>
    %307 = vector.extract_strided_slice %300 {offsets = [0, 32], sizes = [8, 32], strides = [1, 1]} : vector<8x128xf32> to vector<8x32xf32>
    %308 = arith.negf %307 : vector<8x32xf32>
    %309 = math.exp %308 : vector<8x32xf32>
    %cst_57 = arith.constant 1.000000e+00 : f32
    %310 = vector.broadcast %cst_57 : f32 to vector<8x32xf32>
    %311 = arith.addf %310, %309 : vector<8x32xf32>
    %312 = arith.divf %310, %311 : vector<8x32xf32>
    %313 = vector.extract_strided_slice %300 {offsets = [0, 64], sizes = [8, 32], strides = [1, 1]} : vector<8x128xf32> to vector<8x32xf32>
    %314 = math.tanh %313 : vector<8x32xf32>
    %315 = vector.extract_strided_slice %300 {offsets = [0, 96], sizes = [8, 32], strides = [1, 1]} : vector<8x128xf32> to vector<8x32xf32>
    %316 = arith.negf %315 : vector<8x32xf32>
    %317 = math.exp %316 : vector<8x32xf32>
    %cst_58 = arith.constant 1.000000e+00 : f32
    %318 = vector.broadcast %cst_58 : f32 to vector<8x32xf32>
    %319 = arith.addf %318, %317 : vector<8x32xf32>
    %320 = arith.divf %318, %319 : vector<8x32xf32>
    %321 = arith.mulf %312, %266 : vector<8x32xf32>
    %322 = arith.mulf %306, %314 : vector<8x32xf32>
    %323 = arith.addf %321, %322 : vector<8x32xf32>
    %324 = math.tanh %323 : vector<8x32xf32>
    %325 = arith.mulf %320, %324 : vector<8x32xf32>
    %326 = tpu.concatenate %325, %297 in 1 : vector<8x32xf32>, vector<8x32xf32> -> vector<8x64xf32>
    %cst_59 = arith.constant dense<0.000000e+00> : vector<8x128xf32>
    %327 = tpu.matmul %326, %7, %cst_59 {dimension_numbers = #tpu.dot_dimension_numbers<[1], [0], [0], [1], [0, 0, 1, 1], [], []>} : vector<8x64xf32>, vector<64x128xf32>, vector<8x128xf32> -> vector<8x128xf32>
    %328 = vector.broadcast %8 : vector<1x128xf32> to vector<8x128xf32>
    %329 = arith.addf %327, %328 : vector<8x128xf32>
    %330 = vector.extract_strided_slice %329 {offsets = [0, 0], sizes = [8, 32], strides = [1, 1]} : vector<8x128xf32> to vector<8x32xf32>
    %331 = arith.negf %330 : vector<8x32xf32>
    %332 = math.exp %331 : vector<8x32xf32>
    %cst_60 = arith.constant 1.000000e+00 : f32
    %333 = vector.broadcast %cst_60 : f32 to vector<8x32xf32>
    %334 = arith.addf %333, %332 : vector<8x32xf32>
    %335 = arith.divf %333, %334 : vector<8x32xf32>
    %336 = vector.extract_strided_slice %329 {offsets = [0, 32], sizes = [8, 32], strides = [1, 1]} : vector<8x128xf32> to vector<8x32xf32>
    %337 = arith.negf %336 : vector<8x32xf32>
    %338 = math.exp %337 : vector<8x32xf32>
    %cst_61 = arith.constant 1.000000e+00 : f32
    %339 = vector.broadcast %cst_61 : f32 to vector<8x32xf32>
    %340 = arith.addf %339, %338 : vector<8x32xf32>
    %341 = arith.divf %339, %340 : vector<8x32xf32>
    %342 = vector.extract_strided_slice %329 {offsets = [0, 64], sizes = [8, 32], strides = [1, 1]} : vector<8x128xf32> to vector<8x32xf32>
    %343 = math.tanh %342 : vector<8x32xf32>
    %344 = vector.extract_strided_slice %329 {offsets = [0, 96], sizes = [8, 32], strides = [1, 1]} : vector<8x128xf32> to vector<8x32xf32>
    %345 = arith.negf %344 : vector<8x32xf32>
    %346 = math.exp %345 : vector<8x32xf32>
    %cst_62 = arith.constant 1.000000e+00 : f32
    %347 = vector.broadcast %cst_62 : f32 to vector<8x32xf32>
    %348 = arith.addf %347, %346 : vector<8x32xf32>
    %349 = arith.divf %347, %348 : vector<8x32xf32>
    %350 = arith.mulf %341, %295 : vector<8x32xf32>
    %351 = arith.mulf %335, %343 : vector<8x32xf32>
    %352 = arith.addf %350, %351 : vector<8x32xf32>
    %353 = math.tanh %352 : vector<8x32xf32>
    %354 = arith.mulf %349, %353 : vector<8x32xf32>
    %355 = vector.extract_strided_slice %5 {offsets = [48, 0], sizes = [8, 128], strides = [1, 1]} : vector<64x128xf32> to vector<8x128xf32>
    %cst_63 = arith.constant dense<0.000000e+00> : vector<8x128xf32>
    %356 = tpu.matmul %325, %6, %cst_63 {dimension_numbers = #tpu.dot_dimension_numbers<[1], [0], [0], [1], [0, 0, 1, 1], [], []>} : vector<8x32xf32>, vector<32x128xf32>, vector<8x128xf32> -> vector<8x128xf32>
    %357 = arith.addf %355, %356 : vector<8x128xf32>
    %358 = vector.extract_strided_slice %357 {offsets = [0, 0], sizes = [8, 32], strides = [1, 1]} : vector<8x128xf32> to vector<8x32xf32>
    %359 = arith.negf %358 : vector<8x32xf32>
    %360 = math.exp %359 : vector<8x32xf32>
    %cst_64 = arith.constant 1.000000e+00 : f32
    %361 = vector.broadcast %cst_64 : f32 to vector<8x32xf32>
    %362 = arith.addf %361, %360 : vector<8x32xf32>
    %363 = arith.divf %361, %362 : vector<8x32xf32>
    %364 = vector.extract_strided_slice %357 {offsets = [0, 32], sizes = [8, 32], strides = [1, 1]} : vector<8x128xf32> to vector<8x32xf32>
    %365 = arith.negf %364 : vector<8x32xf32>
    %366 = math.exp %365 : vector<8x32xf32>
    %cst_65 = arith.constant 1.000000e+00 : f32
    %367 = vector.broadcast %cst_65 : f32 to vector<8x32xf32>
    %368 = arith.addf %367, %366 : vector<8x32xf32>
    %369 = arith.divf %367, %368 : vector<8x32xf32>
    %370 = vector.extract_strided_slice %357 {offsets = [0, 64], sizes = [8, 32], strides = [1, 1]} : vector<8x128xf32> to vector<8x32xf32>
    %371 = math.tanh %370 : vector<8x32xf32>
    %372 = vector.extract_strided_slice %357 {offsets = [0, 96], sizes = [8, 32], strides = [1, 1]} : vector<8x128xf32> to vector<8x32xf32>
    %373 = arith.negf %372 : vector<8x32xf32>
    %374 = math.exp %373 : vector<8x32xf32>
    %cst_66 = arith.constant 1.000000e+00 : f32
    %375 = vector.broadcast %cst_66 : f32 to vector<8x32xf32>
    %376 = arith.addf %375, %374 : vector<8x32xf32>
    %377 = arith.divf %375, %376 : vector<8x32xf32>
    %378 = arith.mulf %369, %323 : vector<8x32xf32>
    %379 = arith.mulf %363, %371 : vector<8x32xf32>
    %380 = arith.addf %378, %379 : vector<8x32xf32>
    %381 = math.tanh %380 : vector<8x32xf32>
    %382 = arith.mulf %377, %381 : vector<8x32xf32>
    %383 = tpu.concatenate %382, %354 in 1 : vector<8x32xf32>, vector<8x32xf32> -> vector<8x64xf32>
    %cst_67 = arith.constant dense<0.000000e+00> : vector<8x128xf32>
    %384 = tpu.matmul %383, %7, %cst_67 {dimension_numbers = #tpu.dot_dimension_numbers<[1], [0], [0], [1], [0, 0, 1, 1], [], []>} : vector<8x64xf32>, vector<64x128xf32>, vector<8x128xf32> -> vector<8x128xf32>
    %385 = vector.broadcast %8 : vector<1x128xf32> to vector<8x128xf32>
    %386 = arith.addf %384, %385 : vector<8x128xf32>
    %387 = vector.extract_strided_slice %386 {offsets = [0, 0], sizes = [8, 32], strides = [1, 1]} : vector<8x128xf32> to vector<8x32xf32>
    %388 = arith.negf %387 : vector<8x32xf32>
    %389 = math.exp %388 : vector<8x32xf32>
    %cst_68 = arith.constant 1.000000e+00 : f32
    %390 = vector.broadcast %cst_68 : f32 to vector<8x32xf32>
    %391 = arith.addf %390, %389 : vector<8x32xf32>
    %392 = arith.divf %390, %391 : vector<8x32xf32>
    %393 = vector.extract_strided_slice %386 {offsets = [0, 32], sizes = [8, 32], strides = [1, 1]} : vector<8x128xf32> to vector<8x32xf32>
    %394 = arith.negf %393 : vector<8x32xf32>
    %395 = math.exp %394 : vector<8x32xf32>
    %cst_69 = arith.constant 1.000000e+00 : f32
    %396 = vector.broadcast %cst_69 : f32 to vector<8x32xf32>
    %397 = arith.addf %396, %395 : vector<8x32xf32>
    %398 = arith.divf %396, %397 : vector<8x32xf32>
    %399 = vector.extract_strided_slice %386 {offsets = [0, 64], sizes = [8, 32], strides = [1, 1]} : vector<8x128xf32> to vector<8x32xf32>
    %400 = math.tanh %399 : vector<8x32xf32>
    %401 = vector.extract_strided_slice %386 {offsets = [0, 96], sizes = [8, 32], strides = [1, 1]} : vector<8x128xf32> to vector<8x32xf32>
    %402 = arith.negf %401 : vector<8x32xf32>
    %403 = math.exp %402 : vector<8x32xf32>
    %cst_70 = arith.constant 1.000000e+00 : f32
    %404 = vector.broadcast %cst_70 : f32 to vector<8x32xf32>
    %405 = arith.addf %404, %403 : vector<8x32xf32>
    %406 = arith.divf %404, %405 : vector<8x32xf32>
    %407 = arith.mulf %398, %352 : vector<8x32xf32>
    %408 = arith.mulf %392, %400 : vector<8x32xf32>
    %409 = arith.addf %407, %408 : vector<8x32xf32>
    %410 = math.tanh %409 : vector<8x32xf32>
    %411 = arith.mulf %406, %410 : vector<8x32xf32>
    %412 = vector.extract_strided_slice %5 {offsets = [56, 0], sizes = [8, 128], strides = [1, 1]} : vector<64x128xf32> to vector<8x128xf32>
    %cst_71 = arith.constant dense<0.000000e+00> : vector<8x128xf32>
    %413 = tpu.matmul %382, %6, %cst_71 {dimension_numbers = #tpu.dot_dimension_numbers<[1], [0], [0], [1], [0, 0, 1, 1], [], []>} : vector<8x32xf32>, vector<32x128xf32>, vector<8x128xf32> -> vector<8x128xf32>
    %414 = arith.addf %412, %413 : vector<8x128xf32>
    %415 = vector.extract_strided_slice %414 {offsets = [0, 0], sizes = [8, 32], strides = [1, 1]} : vector<8x128xf32> to vector<8x32xf32>
    %416 = arith.negf %415 : vector<8x32xf32>
    %417 = math.exp %416 : vector<8x32xf32>
    %cst_72 = arith.constant 1.000000e+00 : f32
    %418 = vector.broadcast %cst_72 : f32 to vector<8x32xf32>
    %419 = arith.addf %418, %417 : vector<8x32xf32>
    %420 = arith.divf %418, %419 : vector<8x32xf32>
    %421 = vector.extract_strided_slice %414 {offsets = [0, 32], sizes = [8, 32], strides = [1, 1]} : vector<8x128xf32> to vector<8x32xf32>
    %422 = arith.negf %421 : vector<8x32xf32>
    %423 = math.exp %422 : vector<8x32xf32>
    %cst_73 = arith.constant 1.000000e+00 : f32
    %424 = vector.broadcast %cst_73 : f32 to vector<8x32xf32>
    %425 = arith.addf %424, %423 : vector<8x32xf32>
    %426 = arith.divf %424, %425 : vector<8x32xf32>
    %427 = vector.extract_strided_slice %414 {offsets = [0, 64], sizes = [8, 32], strides = [1, 1]} : vector<8x128xf32> to vector<8x32xf32>
    %428 = math.tanh %427 : vector<8x32xf32>
    %429 = vector.extract_strided_slice %414 {offsets = [0, 96], sizes = [8, 32], strides = [1, 1]} : vector<8x128xf32> to vector<8x32xf32>
    %430 = arith.negf %429 : vector<8x32xf32>
    %431 = math.exp %430 : vector<8x32xf32>
    %cst_74 = arith.constant 1.000000e+00 : f32
    %432 = vector.broadcast %cst_74 : f32 to vector<8x32xf32>
    %433 = arith.addf %432, %431 : vector<8x32xf32>
    %434 = arith.divf %432, %433 : vector<8x32xf32>
    %435 = arith.mulf %426, %380 : vector<8x32xf32>
    %436 = arith.mulf %420, %428 : vector<8x32xf32>
    %437 = arith.addf %435, %436 : vector<8x32xf32>
    %438 = math.tanh %437 : vector<8x32xf32>
    %439 = arith.mulf %434, %438 : vector<8x32xf32>
    %440 = tpu.concatenate %439, %411 in 1 : vector<8x32xf32>, vector<8x32xf32> -> vector<8x64xf32>
    %cst_75 = arith.constant dense<0.000000e+00> : vector<8x128xf32>
    %441 = tpu.matmul %440, %7, %cst_75 {dimension_numbers = #tpu.dot_dimension_numbers<[1], [0], [0], [1], [0, 0, 1, 1], [], []>} : vector<8x64xf32>, vector<64x128xf32>, vector<8x128xf32> -> vector<8x128xf32>
    %442 = vector.broadcast %8 : vector<1x128xf32> to vector<8x128xf32>
    %443 = arith.addf %441, %442 : vector<8x128xf32>
    %444 = vector.extract_strided_slice %443 {offsets = [0, 0], sizes = [8, 32], strides = [1, 1]} : vector<8x128xf32> to vector<8x32xf32>
    %445 = arith.negf %444 : vector<8x32xf32>
    %446 = math.exp %445 : vector<8x32xf32>
    %cst_76 = arith.constant 1.000000e+00 : f32
    %447 = vector.broadcast %cst_76 : f32 to vector<8x32xf32>
    %448 = arith.addf %447, %446 : vector<8x32xf32>
    %449 = arith.divf %447, %448 : vector<8x32xf32>
    %450 = vector.extract_strided_slice %443 {offsets = [0, 32], sizes = [8, 32], strides = [1, 1]} : vector<8x128xf32> to vector<8x32xf32>
    %451 = arith.negf %450 : vector<8x32xf32>
    %452 = math.exp %451 : vector<8x32xf32>
    %cst_77 = arith.constant 1.000000e+00 : f32
    %453 = vector.broadcast %cst_77 : f32 to vector<8x32xf32>
    %454 = arith.addf %453, %452 : vector<8x32xf32>
    %455 = arith.divf %453, %454 : vector<8x32xf32>
    %456 = vector.extract_strided_slice %443 {offsets = [0, 64], sizes = [8, 32], strides = [1, 1]} : vector<8x128xf32> to vector<8x32xf32>
    %457 = math.tanh %456 : vector<8x32xf32>
    %458 = vector.extract_strided_slice %443 {offsets = [0, 96], sizes = [8, 32], strides = [1, 1]} : vector<8x128xf32> to vector<8x32xf32>
    %459 = arith.negf %458 : vector<8x32xf32>
    %460 = math.exp %459 : vector<8x32xf32>
    %cst_78 = arith.constant 1.000000e+00 : f32
    %461 = vector.broadcast %cst_78 : f32 to vector<8x32xf32>
    %462 = arith.addf %461, %460 : vector<8x32xf32>
    %463 = arith.divf %461, %462 : vector<8x32xf32>
    %464 = arith.mulf %455, %409 : vector<8x32xf32>
    %465 = arith.mulf %449, %457 : vector<8x32xf32>
    %466 = arith.addf %464, %465 : vector<8x32xf32>
    %467 = math.tanh %466 : vector<8x32xf32>
    %468 = arith.mulf %463, %467 : vector<8x32xf32>
    %c0_79 = arith.constant 0 : index
    %c0_80 = arith.constant 0 : index
    %469 = vector.load %arg6[%c0_79, %c0_80] : memref<32x128xf32, #tpu.memory_space<vmem>>, vector<32x128xf32>
    %cst_81 = arith.constant dense<0.000000e+00> : vector<8x128xf32>
    %470 = tpu.matmul %468, %469, %cst_81 {dimension_numbers = #tpu.dot_dimension_numbers<[1], [0], [0], [1], [0, 0, 1, 1], [], []>} : vector<8x32xf32>, vector<32x128xf32>, vector<8x128xf32> -> vector<8x128xf32>
    %c0_82 = arith.constant 0 : index
    %c0_83 = arith.constant 0 : index
    %471 = vector.load %arg7[%c0_82, %c0_83] : memref<1x128xf32, #tpu.memory_space<vmem>>, vector<1x128xf32>
    %472 = vector.broadcast %471 : vector<1x128xf32> to vector<8x128xf32>
    %473 = arith.addf %470, %472 : vector<8x128xf32>
    %c0_84 = arith.constant 0 : index
    %c0_85 = arith.constant 0 : index
    %474 = vector.load %arg8[%c0_84, %c0_85] : memref<8x128xf32, #tpu.memory_space<vmem>>, vector<8x128xf32>
    tpu.vector_store %arg8[%c0_84, %c0_85], %473 {strides = array<i32>} : memref<8x128xf32, #tpu.memory_space<vmem>>, vector<8x128xf32>,
    return
  }
}

</mosaic_0001>

<bundles_post_ra>
// kernel: tpu_custom_call.1
= control target key start
LH: loop header
LB: loop body
LE: loop exit
PB: predicated region body
PF: predicated region fallthrough
CT: control target
= control target key end

     0   :  { %13 = vsyncpa [#allocation3], 0  ;;  %s3248_s0 = inlined_call_operand.vmem [shape: f32[64,32], index: 0, kind: input, shape index: {}]   ;;  %s3249_s1 = inlined_call_operand.vmem [shape: f32[32,128], index: 1, kind: input, shape index: {}]   ;;  %s3250_s2 = inlined_call_operand.vmem [shape: f32[1,128], index: 2, kind: input, shape index: {}]   ;;  %s3251_s3 = inlined_call_operand.hbm [shape: f32[32,128], index: 3, kind: input, shape index: {}]   ;;  %s3252_s4 = inlined_call_operand.vmem [shape: f32[64,128], index: 4, kind: input, shape index: {}]   ;;  %s3253_s5 = inlined_call_operand.vmem [shape: f32[1,128], index: 5, kind: input, shape index: {}]   ;;  %s3254_s6 = inlined_call_operand.hbm [shape: f32[32,128], index: 6, kind: input, shape index: {}]   ;;  %s3255_s7 = inlined_call_operand.vmem [shape: f32[1,128], index: 7, kind: input, shape index: {}]   ;;  %s3256_s8 = inlined_call_operand.hbm [shape: f32[8,128], index: 8, kind: output, shape index: {}]  }
   0x1   :  { %14 = vsyncpa [#allocation6], 0 }
   0x2   :  { %15 = vsyncpa [#allocation4], 0  ;;  %s2762_s27 = smov [#allocation2]   ;;  %s2690_s9 = scalar_lea.hbm %s3251_s3, 512 }
   0x3   :  { %s27_s28 = sshll.u32 %s2762_s27, 4  ;;  %p2691_p0 = scmp.ne.s32.totalorder %s3251_s3, %s2690_s9  ;;  %s28_s28 = int_to_ptr.vmem [resolvable:$true] %s27_s28 }
   0x4   :  { %p2694_p1 = scmp.lt.u32.totalorder %s2690_s9, %s3251_s3 }
   0x6   :  { %p2696_p2 = pnand %p2694_p1, %p2691_p0 }
   0x8   :  { %2699 = shalt.err (!%p2696_p2)
}
   0x9   :  { %s2700_s14 = scalar_lea.vmem %s28_s28, 512  ;;  %p2705_p4 = scmp.lt.s32.totalorder %s28_s28, %s28_s28 }
   0xa   :  { %p2701_p3 = scmp.ne.s32.totalorder %s28_s28, %s2700_s14  ;;  %p2706_p5 = scmp.lt.s32.totalorder %s2700_s14, %s2700_s14 }
   0xc   :  { %p2707_p6 = por %p2706_p5, %p2705_p4 }
   0xe   :  { %p2708_p7 = pnand %p2707_p6, %p2701_p3 }
  0x10   :  { %2711 = shalt.err (!%p2708_p7)
}
  0x11   :  { %s2763_s15 = smov 128   ;;  %s2764_s16 = smov 8  }
  0x12   :  { %33 = dma.hbm_to_vmem [thread:$0]  %s3251_s3, 512, %s28_s28, [#allocation3], %s2763_s15, %s2763_s15, %s2764_s16  }
  0x13   :  { %s2765_s19 = smov [#allocation5]   ;;  %s2712_s23 = scalar_lea.hbm %s3254_s6, 512 }
  0x14   :  { %s43_s20 = sshll.u32 %s2765_s19, 4  ;;  %p2713_p8 = scmp.ne.s32.totalorder %s3254_s6, %s2712_s23  ;;  %s44_s20 = int_to_ptr.vmem [resolvable:$true] %s43_s20 }
  0x15   :  { %p2716_p9 = scmp.lt.u32.totalorder %s2712_s23, %s3254_s6 }
  0x17   :  { %p2718_p10 = pnand %p2716_p9, %p2713_p8 }
  0x19   :  { %2721 = shalt.err (!%p2718_p10)
}
  0x1a   :  { %s2722_s29 = scalar_lea.vmem %s44_s20, 512  ;;  %p2727_p12 = scmp.lt.s32.totalorder %s44_s20, %s44_s20 }
  0x1b   :  { %p2723_p11 = scmp.ne.s32.totalorder %s44_s20, %s2722_s29  ;;  %p2728_p13 = scmp.lt.s32.totalorder %s2722_s29, %s2722_s29 }
  0x1d   :  { %p2729_p0 = por %p2728_p13, %p2727_p12 }
  0x1f   :  { %p2730_p1 = pnand %p2729_p0, %p2723_p11 }
  0x21   :  { %2733 = shalt.err (!%p2730_p1)
}
  0x22   :  { %49 = dma.hbm_to_vmem [thread:$0]  %s3254_s6, 512, %s44_s20, [#allocation6], %s2763_s15, %s2763_s15, %s2764_s16  }
  0x23   :  { %2756 = dma.done.wait [#allocation3], 512  }
  0x24   :  { %2757 = vsyncadd [#allocation3], 4294966784 }
  0x25   :  { %2758 = dma.done.wait [#allocation6], 512  }
  0x26   :  { %2759 = vsyncadd [#allocation6], 4294966784  ;;  %v2766_v0 = vmov 0.0|0.0   ;;  %vm2767_vm0 = vmmov 0   ;;  %v2768_v1 = vmov 0.0   ;;  %v66_v2 = vld [vmem:[%s3249_s1] sm:$0xff] }
  0x27   :  { %2402 = vmatprep.subr.bf16.mxu1 %v2766_v0  ;;  %2151 = vmatprep.mubr.msk.f32.mxu1 %vm2767_vm0, %v2768_v1  ;;  %v67_v3 = vld [vmem:[%s3249_s1 + $0x8] sm:$0xff]  ;;  %v207_v4 = vld [vmem:[#allocation2] sm:$0xff]  ;;  %vm77_vm1 = vcmask 261120   ;;  %v68_v7 = vld [vmem:[%s3249_s1 + $0x10] sm:$0xff]  ;;  %s2769_s20 = smov 64   ;;  %vm329_vm2 = vcmask 523264  }
  0x28   :  { %v2394_v5 = vpack.c.bf16 %v67_v3, %v66_v2  ;;  %v208_v6 = vld [vmem:[#allocation2 + $0x8] sm:$0xff]  ;;  %v69_v8 = vld [vmem:[%s3249_s1 + $0x18] sm:$0xff]  ;;  %v58_v11 = vld [vmem:[%s3248_s0] sm:$0xff]  ;;  %s2771_s26 = smov [#allocation7]  }
  0x29   :  { %v2856_v9 = vpack.c.bf16 %v208_v6, %v207_v4  ;;  %v2398_v10 = vpack.c.bf16 %v69_v8, %v68_v7  ;;  %v209_v12 = vld [vmem:[#allocation2 + $0x10] sm:$0xff]  ;;  %v210_v13 = vld [vmem:[#allocation2 + $0x18] sm:$0xff]  ;;  %2131 = vmatprep.mubr.msk.f32.mxu0 %vm77_vm1, %v58_v11  ;;  %v59_v15 = vld [vmem:[%s3248_s0 + $0x8] sm:$0xff]  ;;  %s1941_s27 = sshll.u32 %s2771_s26, 4  ;;  %s1942_s27 = int_to_ptr.vmem [resolvable:$true] %s1941_s27 }
  0x2a   :  { %2395 = vmatprep.subr.bf16.mxu0 %v2394_v5  ;;  %v2863_v14 = vpack.c.bf16 %v210_v13, %v209_v12  ;;  %v2883_v16 = vld [vmem:[%s3250_s2] ss:$0 sm:$0xff]  ;;  %s2770_s2 = smov 32   ;;  %v212_v34 = vld [vmem:[%s3252_s4 + $0x8] sm:$0xff]  ;;  %v60_v35 = vld [vmem:[%s3248_s0 + $0x10] sm:$0xff]  ;;  %s2734_s29 = scalar_lea.vmem %s1942_s27, 128 }
  0x2b   :  { %2397 = vmatpush3.bf16.msra.mxu0 %v2394_v5  ;;  %2404 = vmatpush3.bf16.msra.mxu1 %v2856_v9  ;;  %v211_v33 = vld [vmem:[%s3252_s4] sm:$0xff]  ;;  %v61_v37 = vld [vmem:[%s3248_s0 + $0x18] sm:$0xff]  ;;  %v213_v38 = vld [vmem:[%s3252_s4 + $0x10] sm:$0xff]  ;;  %p2735_p2 = scmp.ne.s32.totalorder %s1942_s27, %s2734_s29  ;;  %p2739_p3 = scmp.lt.s32.totalorder %s1942_s27, %s1942_s27 }
  0x2c   :  { %2399 = vmatprep.subr.bf16.mxu0 %v2398_v10  ;;  %2405 = vmatprep.subr.bf16.mxu1 %v2766_v0  ;;  %v2902_v36 = vpack.c.bf16 %v212_v34, %v211_v33  ;;  %v214_v39 = vld [vmem:[%s3252_s4 + $0x18] sm:$0xff]  ;;  %v62_v40 = vld [vmem:[%s3248_s0 + $0x20] sm:$0xff]  ;;  %v63_v42 = vld [vmem:[%s3248_s0 + $0x28] sm:$0xff]  ;;  %p2740_p4 = scmp.lt.s32.totalorder %s2734_s29, %s2734_s29 }
  0x2d   :  { %v2919_v41 = vpack.c.bf16 %v214_v39, %v213_v38  ;;  %v215_v43 = vld [vmem:[%s3252_s4 + $0x20] sm:$0xff]  ;;  %v216_v44 = vld [vmem:[%s3252_s4 + $0x28] sm:$0xff]  ;;  %v64_v45 = vld [vmem:[%s3248_s0 + $0x30] sm:$0xff] }
  0x2e   :  { %v2937_v46 = vpack.c.bf16 %v216_v44, %v215_v43  ;;  %v65_v47 = vld [vmem:[%s3248_s0 + $0x38] sm:$0xff]  ;;  %v217_v48 = vld [vmem:[%s3252_s4 + $0x30] sm:$0xff]  ;;  %v2997_v63 = vld [vmem:[%s3253_s5] ss:$0 sm:$0xff]  ;;  %p2741_p5 = por %p2740_p4, %p2739_p3 }
  0x2f   :  { %2401 = vmatpush3.bf16.msra.mxu0 %v2398_v10  ;;  %2407 = vmatpush3.bf16.msra.mxu1 %v2863_v14  ;;  %v218_v49 = vld [vmem:[%s3252_s4 + $0x38] sm:$0xff] }
  0x30   :  { %2408 = vmatprep.subr.bf16.mxu0 %v2766_v0  ;;  %2420 = vmatprep.subr.bf16.mxu1 %v2766_v0  ;;  %v2953_v51 = vpack.c.bf16 %v218_v49, %v217_v48  ;;  %p2742_p6 = pnand %p2741_p5, %p2735_p2 }
  0x32   :  { %2132 = vmatmul.mubr.msk.f32.vlgmr.msra.gmra.mrb[0].mxu0 %vm77_vm1, %v59_v15  ;;  %2152 = vmatmul.mubr.f32.vlgmr.msra.gmra.mrb[0].mxu1 %v2768_v1 }
  0x33   :  { %2422 = vmatpush3.bf16.msra.mxu1 %v2856_v9  ;;  %2181 = vmatprep.mubr.msk.f32.mxu1 %vm2767_vm0, %v2768_v1 }
  0x34   :  { %2423 = vmatprep.subr.bf16.mxu1 %v2766_v0  ;;  %2134 = vmatprep.mubr.msk.f32.mxu0 %vm77_vm1, %v60_v35 }
  0x35   :  { %2410 = vmatpush3.bf16.msra.mxu0 %v2902_v36 }
  0x36   :  { %2135 = vmatmul.mubr.msk.f32.gmra.mrb[2].mxu0 %vm77_vm1, %v61_v37  ;;  %2411 = vmatprep.subr.bf16.mxu0 %v2766_v0 }
  0x37   :  { %2425 = vmatpush3.bf16.msra.mxu1 %v2863_v14  ;;  %2137 = vmatprep.mubr.msk.f32.mxu0 %vm77_vm1, %v62_v40 }
  0x38   :  { %2426 = vmatprep.subr.bf16.mxu1 %v2766_v0 }
  0x39   :  { %2413 = vmatpush3.bf16.msra.mxu0 %v2919_v41 }
  0x3a   :  { %2138 = vmatmul.mubr.msk.f32.gmra.mrb[4].mxu0 %vm77_vm1, %v63_v42  ;;  %2414 = vmatprep.subr.bf16.mxu0 %v2766_v0 }
  0x3b   :  { %2140 = vmatprep.mubr.msk.f32.mxu0 %vm77_vm1, %v64_v45 }
  0x3d   :  { %2416 = vmatpush3.bf16.msra.mxu0 %v2937_v46 }
  0x3e   :  { %2141 = vmatmul.mubr.msk.f32.gmra.mrb[6].mxu0 %vm77_vm1, %v65_v47  ;;  %2417 = vmatprep.subr.bf16.mxu0 %v2766_v0 }
  0x3f   :  { %2170 = vmatprep.mubr.msk.f32.mxu0 %vm2767_vm0, %v2768_v1 }
  0x41   :  { %2419 = vmatpush3.bf16.msra.mxu0 %v2953_v51 }
  0x42   :  { %2438 = vmatprep.subr.bf16.mxu0 %v2766_v0 }
 0x105   :  { %v2885_v17 = vpop.f32.mrb[0].mxu0  ;;  %v289_v18 = vpop.f32.mrb[0].mxu1 }
 0x106   :  { %v168_v19 = vpop.f32.mrb[1].mxu0  ;;  %v2153_v20 = vpop.f32.mrb[1].mxu1  ;;  %v174_v62 = vadd.f32 %v2885_v17, %v2883_v16 }
 0x107   :  { %v169_v21 = vadd.f32 %v2883_v16, %v168_v19 }
 0x109   :  { %v293_v22 = vadd.f32 %v289_v18, %v169_v21  ;;  %v2961_v54 = vpop.f32.mrb[2].mxu0 }
 0x10a   :  { %v2963_v55 = vpop.f32.mrb[3].mxu0 }
 0x10b   :  { %2562 = vtanh.f32 %v293_v22  ;;  %v1960_v24 = vmul.f32 -1.442695, %v293_v22  ;;  %v179_v42 = vadd.f32 %v2883_v16, %v2963_v55 }
 0x10d   :  { %2564 = vpow2.f32 %v1960_v24  ;;  %v2965_v56 = vpop.f32.mrb[4].mxu0 }
 0x10e   :  { %v2967_v57 = vpop.f32.mrb[5].mxu0 }
 0x111   :  { %v2969_v58 = vpop.f32.mrb[6].mxu0 }
 0x112   :  { %v2971_v59 = vpop.f32.mrb[7].mxu0 }
 0x115   :  { %v2563_v23 = vpop.eup %2562 }
 0x116   :  { %303 = vrot.lane.b32.xlu0 %v2563_v23, %s2769_s20 }
 0x117   :  { %v2565_v25 = vpop.eup %2564 }
 0x118   :  { %v297_v26 = vadd.f32 1.0, %v2565_v25 }
 0x11a   :  { %2566 = vrcp.f32 %v297_v26 }
 0x124   :  { %v2567_v27 = vpop.eup %2566 }
 0x125   :  { %v301_v30 = vmul.f32 0.0, %v2567_v27 }
 0x188   :  { %v304_v28 = vpop.permute.xlu0 %303 }
 0x189   :  { %v306_v29 = vmul.f32 %v2567_v27, %v304_v28 }
 0x18b   :  { %308 = vrot.lane.b32.xlu0 %v306_v29, %s2770_s2 }
 0x1fd   :  { %v309_v31 = vpop.permute.xlu0 %308 }
 0x1fe   :  { %v2890_v32 = vadd.f32 %v309_v31, %v301_v30 }
 0x200   :  { %2568 = vtanh.f32 %v2890_v32 }
 0x20a   :  { %v2569_v50 = vpop.eup %2568 }
 0x20b   :  { %314 = vrot.lane.b32.xlu1 %v2569_v50, %s2769_s20 }
 0x27d   :  { %v315_v52 = vpop.permute.xlu1 %314 }
 0x27e   :  { %v317_v53 = vmul.f32 %v2567_v27, %v315_v52 }
 0x280   :  { %319 = vrot.lane.b32.xlu1 %v317_v53, %s2770_s2 }
 0x2f2   :  { %v320_v60 = vpop.permute.xlu1 %319 }
 0x2f3   :  { %v322_v61 = vsel %vm77_vm1, %v320_v60, 0.0  ;;  %2182 = vmatmul.mubr.msk.f32.vlgmr.msra.gmra.mrb[2].mxu1 %vm77_vm1, %v320_v60 }
 0x2f4   :  { %2171 = vmatmul.mubr.msk.f32.vlgmr.msra.gmra.mrb[8].mxu0 %vm329_vm2, %v322_v61  ;;  %2428 = vmatpush3.bf16.msra.mxu1 %v2902_v36 }
 0x2f5   :  { %2429 = vmatprep.subr.bf16.mxu1 %v2766_v0  ;;  %2440 = vmatpush3.bf16.msra.mxu0 %v2856_v9 }
 0x2f6   :  { %2441 = vmatprep.subr.bf16.mxu0 %v2766_v0  ;;  %2211 = vmatprep.mubr.msk.f32.mxu0 %vm2767_vm0, %v2768_v1 }
 0x2f7   :  { %2200 = vmatprep.mubr.msk.f32.mxu1 %vm2767_vm0, %v2768_v1 }
 0x2f8   :  { %2431 = vmatpush3.bf16.msra.mxu1 %v2919_v41 }
 0x2f9   :  { %2432 = vmatprep.subr.bf16.mxu1 %v2766_v0  ;;  %2443 = vmatpush3.bf16.msra.mxu0 %v2863_v14 }
 0x2fa   :  { %2444 = vmatprep.subr.bf16.mxu0 %v2766_v0 }
 0x2fc   :  { %2434 = vmatpush3.bf16.msra.mxu1 %v2937_v46 }
 0x2fd   :  { %2435 = vmatprep.subr.bf16.mxu1 %v2766_v0 }
 0x300   :  { %2437 = vmatpush3.bf16.msra.mxu1 %v2953_v51 }
 0x301   :  { %2456 = vmatprep.subr.bf16.mxu1 %v2766_v0 }
 0x3c6   :  { %v495_v2 = vpop.f32.mrb[2].mxu1 }
 0x3c7   :  { %v499_v3 = vadd.f32 %v495_v2, %v174_v62  ;;  %v399_v4 = vpop.f32.mrb[8].mxu0  ;;  %v2183_v5 = vpop.f32.mrb[3].mxu1 }
 0x3c8   :  { %v400_v6 = vadd.f32 %v2997_v63, %v399_v4  ;;  %v2172_v7 = vpop.f32.mrb[9].mxu0 }
 0x3c9   :  { %2570 = vtanh.f32 %v499_v3  ;;  %v1965_v11 = vmul.f32 -1.442695, %v499_v3 }
 0x3ca   :  { %2572 = vtanh.f32 %v400_v6  ;;  %v1963_v12 = vmul.f32 -1.442695, %v400_v6 }
 0x3cb   :  { %2574 = vpow2.f32 %v1965_v11 }
 0x3cc   :  { %2576 = vpow2.f32 %v1963_v12 }
 0x3d3   :  { %v2571_v8 = vpop.eup %2570 }
 0x3d4   :  { %v2573_v10 = vpop.eup %2572  ;;  %509 = vrot.lane.b32.xlu1 %v2571_v8, %s2769_s20 }
 0x3d5   :  { %412 = vrot.lane.b32.xlu0 %v2573_v10, %s2769_s20  ;;  %v2575_v13 = vpop.eup %2574 }
 0x3d6   :  { %v2577_v15 = vpop.eup %2576  ;;  %v503_v17 = vadd.f32 1.0, %v2575_v13 }
 0x3d7   :  { %v406_v18 = vadd.f32 1.0, %v2577_v15 }
 0x3d8   :  { %2578 = vrcp.f32 %v503_v17 }
 0x3d9   :  { %2580 = vrcp.f32 %v406_v18 }
 0x3e2   :  { %v2579_v19 = vpop.eup %2578 }
 0x3e3   :  { %v2581_v21 = vpop.eup %2580  ;;  %v507_v25 = vmul.f32 %v2579_v19, %v2890_v32 }
 0x3e4   :  { %v410_v27 = vmul.f32 0.0, %v2581_v21 }
 0x446   :  { %v510_v20 = vpop.permute.xlu1 %509 }
 0x447   :  { %v512_v22 = vmul.f32 %v2579_v19, %v510_v20  ;;  %v413_v23 = vpop.permute.xlu0 %412 }
 0x448   :  { %v415_v24 = vmul.f32 %v2581_v21, %v413_v23 }
 0x449   :  { %514 = vrot.lane.b32.xlu1 %v512_v22, %s2770_s2 }
 0x44a   :  { %417 = vrot.lane.b32.xlu0 %v415_v24, %s2770_s2 }
 0x4bb   :  { %v515_v26 = vpop.permute.xlu1 %514 }
 0x4bc   :  { %v3005_v28 = vadd.f32 %v515_v26, %v507_v25  ;;  %v418_v29 = vpop.permute.xlu0 %417 }
 0x4bd   :  { %v3007_v30 = vadd.f32 %v418_v29, %v410_v27  ;;  %v184_v27 = vadd.f32 %v2961_v54, %v2883_v16 }
 0x4be   :  { %2582 = vtanh.f32 %v3005_v28 }
 0x4bf   :  { %2584 = vtanh.f32 %v3007_v30 }
 0x4c8   :  { %v2583_v31 = vpop.eup %2582 }
 0x4c9   :  { %v2585_v33 = vpop.eup %2584  ;;  %520 = vrot.lane.b32.xlu1 %v2583_v31, %s2769_s20 }
 0x4ca   :  { %423 = vrot.lane.b32.xlu0 %v2585_v33, %s2769_s20 }
 0x53b   :  { %v521_v34 = vpop.permute.xlu1 %520 }
 0x53c   :  { %v523_v35 = vmul.f32 %v2579_v19, %v521_v34  ;;  %v424_v32 = vpop.permute.xlu0 %423 }
 0x53d   :  { %v426_v37 = vmul.f32 %v2581_v21, %v424_v32 }
 0x53e   :  { %525 = vrot.lane.b32.xlu0 %v523_v35, %s2770_s2 }
 0x53f   :  { %529 = vrot.lane.b32.xlu1 %v426_v37, %s2769_s20 }
 0x5b0   :  { %v526_v38 = vpop.permute.xlu0 %525 }
 0x5b1   :  { %v530_v39 = vpop.permute.xlu1 %529  ;;  %2212 = vmatmul.mubr.msk.f32.vlgmr.msra.gmra.mrb[10].mxu0 %vm77_vm1, %v526_v38 }
 0x5b2   :  { %v532_v40 = vsel %vm77_vm1, %v526_v38, %v530_v39  ;;  %2446 = vmatpush3.bf16.msra.mxu0 %v2902_v36  ;;  %2230 = vmatprep.mubr.msk.f32.mxu0 %vm2767_vm0, %v2768_v1 }
 0x5b3   :  { %2201 = vmatmul.mubr.msk.f32.vlgmr.msra.gmra.mrb[4].mxu1 %vm329_vm2, %v532_v40  ;;  %2447 = vmatprep.subr.bf16.mxu0 %v2766_v0 }
 0x5b4   :  { %2458 = vmatpush3.bf16.msra.mxu1 %v2856_v9  ;;  %2241 = vmatprep.mubr.msk.f32.mxu1 %vm2767_vm0, %v2768_v1 }
 0x5b5   :  { %2459 = vmatprep.subr.bf16.mxu1 %v2766_v0 }
 0x5b6   :  { %2449 = vmatpush3.bf16.msra.mxu0 %v2919_v41 }
 0x5b7   :  { %2450 = vmatprep.subr.bf16.mxu0 %v2766_v0 }
 0x5b8   :  { %2461 = vmatpush3.bf16.msra.mxu1 %v2863_v14 }
 0x5b9   :  { %2462 = vmatprep.subr.bf16.mxu1 %v2766_v0 }
 0x5ba   :  { %2452 = vmatpush3.bf16.msra.mxu0 %v2937_v46 }
 0x5bb   :  { %2453 = vmatprep.subr.bf16.mxu0 %v2766_v0 }
 0x5be   :  { %2455 = vmatpush3.bf16.msra.mxu0 %v2953_v51 }
 0x5bf   :  { %2474 = vmatprep.subr.bf16.mxu0 %v2766_v0 }
 0x684   :  { %v698_v43 = vpop.f32.mrb[10].mxu0 }
 0x685   :  { %v702_v44 = vadd.f32 %v698_v43, %v179_v42  ;;  %v2213_v45 = vpop.f32.mrb[11].mxu0 }
 0x686   :  { %v602_v47 = vpop.f32.mrb[4].mxu1 }
 0x687   :  { %2586 = vtanh.f32 %v702_v44  ;;  %v603_v48 = vadd.f32 %v2997_v63, %v602_v47  ;;  %v2202_v49 = vpop.f32.mrb[5].mxu1  ;;  %v1969_v53 = vmul.f32 -1.442695, %v702_v44 }
 0x689   :  { %2588 = vtanh.f32 %v603_v48  ;;  %v1967_v60 = vmul.f32 -1.442695, %v603_v48 }
 0x68a   :  { %2590 = vpow2.f32 %v1969_v53 }
 0x68b   :  { %2592 = vpow2.f32 %v1967_v60 }
 0x691   :  { %v2587_v50 = vpop.eup %2586 }
 0x692   :  { %712 = vrot.lane.b32.xlu1 %v2587_v50, %s2769_s20 }
 0x693   :  { %v2589_v52 = vpop.eup %2588 }
 0x694   :  { %615 = vrot.lane.b32.xlu0 %v2589_v52, %s2769_s20  ;;  %v2591_v55 = vpop.eup %2590 }
 0x695   :  { %v2593_v61 = vpop.eup %2592  ;;  %v706_v62 = vadd.f32 1.0, %v2591_v55 }
 0x696   :  { %v609_v2 = vadd.f32 1.0, %v2593_v61 }
 0x697   :  { %2594 = vrcp.f32 %v706_v62 }
 0x698   :  { %2596 = vrcp.f32 %v609_v2 }
 0x6a1   :  { %v2595_v3 = vpop.eup %2594 }
 0x6a2   :  { %v2597_v6 = vpop.eup %2596  ;;  %v710_v10 = vmul.f32 %v2595_v3, %v3005_v28 }
 0x6a3   :  { %v613_v13 = vmul.f32 %v2597_v6, %v3007_v30 }
 0x704   :  { %v713_v4 = vpop.permute.xlu1 %712 }
 0x705   :  { %v715_v5 = vmul.f32 %v2595_v3, %v713_v4 }
 0x706   :  { %v616_v7 = vpop.permute.xlu0 %615 }
 0x707   :  { %717 = vrot.lane.b32.xlu1 %v715_v5, %s2770_s2  ;;  %v618_v8 = vmul.f32 %v2597_v6, %v616_v7 }
 0x709   :  { %620 = vrot.lane.b32.xlu0 %v618_v8, %s2770_s2 }
 0x779   :  { %v718_v11 = vpop.permute.xlu1 %717 }
 0x77a   :  { %v3042_v12 = vadd.f32 %v718_v11, %v710_v10  ;;  %v189_v11 = vadd.f32 %v2883_v16, %v2967_v57 }
 0x77b   :  { %v621_v15 = vpop.permute.xlu0 %620 }
 0x77c   :  { %2598 = vtanh.f32 %v3042_v12  ;;  %v3046_v17 = vadd.f32 %v621_v15, %v613_v13 }
 0x77e   :  { %2600 = vtanh.f32 %v3046_v17 }
 0x786   :  { %v2599_v18 = vpop.eup %2598 }
 0x787   :  { %723 = vrot.lane.b32.xlu1 %v2599_v18, %s2769_s20 }
 0x788   :  { %v2601_v19 = vpop.eup %2600 }
 0x789   :  { %626 = vrot.lane.b32.xlu0 %v2601_v19, %s2769_s20 }
 0x7f9   :  { %v724_v20 = vpop.permute.xlu1 %723 }
 0x7fa   :  { %v726_v21 = vmul.f32 %v2595_v3, %v724_v20 }
 0x7fb   :  { %v627_v22 = vpop.permute.xlu0 %626 }
 0x7fc   :  { %728 = vrot.lane.b32.xlu0 %v726_v21, %s2770_s2  ;;  %v629_v23 = vmul.f32 %v2597_v6, %v627_v22 }
 0x7fe   :  { %732 = vrot.lane.b32.xlu1 %v629_v23, %s2769_s20 }
 0x86e   :  { %v729_v24 = vpop.permute.xlu0 %728 }
 0x86f   :  { %2242 = vmatmul.mubr.msk.f32.vlgmr.msra.gmra.mrb[6].mxu1 %vm77_vm1, %v729_v24 }
 0x870   :  { %2464 = vmatpush3.bf16.msra.mxu1 %v2902_v36  ;;  %2260 = vmatprep.mubr.msk.f32.mxu1 %vm2767_vm0, %v2768_v1  ;;  %v733_v25 = vpop.permute.xlu1 %732 }
 0x871   :  { %2465 = vmatprep.subr.bf16.mxu1 %v2766_v0  ;;  %v735_v26 = vsel %vm77_vm1, %v729_v24, %v733_v25 }
 0x872   :  { %2231 = vmatmul.mubr.msk.f32.vlgmr.msra.gmra.mrb[12].mxu0 %vm329_vm2, %v735_v26 }
 0x873   :  { %2476 = vmatpush3.bf16.msra.mxu0 %v2856_v9  ;;  %2271 = vmatprep.mubr.msk.f32.mxu0 %vm2767_vm0, %v2768_v1 }
 0x874   :  { %2467 = vmatpush3.bf16.msra.mxu1 %v2919_v41  ;;  %2477 = vmatprep.subr.bf16.mxu0 %v2766_v0 }
 0x875   :  { %2468 = vmatprep.subr.bf16.mxu1 %v2766_v0 }
 0x877   :  { %2479 = vmatpush3.bf16.msra.mxu0 %v2863_v14 }
 0x878   :  { %2470 = vmatpush3.bf16.msra.mxu1 %v2937_v46  ;;  %2480 = vmatprep.subr.bf16.mxu0 %v2766_v0 }
 0x879   :  { %2471 = vmatprep.subr.bf16.mxu1 %v2766_v0 }
 0x87c   :  { %2473 = vmatpush3.bf16.msra.mxu1 %v2953_v51 }
 0x87d   :  { %2492 = vmatprep.subr.bf16.mxu1 %v2766_v0 }
 0x942   :  { %v901_v28 = vpop.f32.mrb[6].mxu1 }
 0x943   :  { %v905_v29 = vadd.f32 %v901_v28, %v184_v27  ;;  %v2243_v30 = vpop.f32.mrb[7].mxu1 }
 0x945   :  { %2602 = vtanh.f32 %v905_v29  ;;  %v805_v31 = vpop.f32.mrb[12].mxu0  ;;  %v1973_v37 = vmul.f32 -1.442695, %v905_v29 }
 0x946   :  { %v806_v33 = vadd.f32 %v2997_v63, %v805_v31  ;;  %v2232_v34 = vpop.f32.mrb[13].mxu0 }
 0x948   :  { %2604 = vtanh.f32 %v806_v33  ;;  %v1971_v38 = vmul.f32 -1.442695, %v806_v33 }
 0x949   :  { %2606 = vpow2.f32 %v1973_v37 }
 0x94a   :  { %2608 = vpow2.f32 %v1971_v38 }
 0x94f   :  { %v2603_v35 = vpop.eup %2602 }
 0x950   :  { %915 = vrot.lane.b32.xlu1 %v2603_v35, %s2769_s20 }
 0x952   :  { %v2605_v32 = vpop.eup %2604 }
 0x953   :  { %818 = vrot.lane.b32.xlu0 %v2605_v32, %s2769_s20  ;;  %v2607_v54 = vpop.eup %2606 }
 0x954   :  { %v909_v39 = vadd.f32 1.0, %v2607_v54  ;;  %v2609_v40 = vpop.eup %2608 }
 0x955   :  { %v812_v42 = vadd.f32 1.0, %v2609_v40 }
 0x956   :  { %2610 = vrcp.f32 %v909_v39 }
 0x957   :  { %2612 = vrcp.f32 %v812_v42 }
 0x960   :  { %v2611_v43 = vpop.eup %2610 }
 0x961   :  { %v2613_v47 = vpop.eup %2612  ;;  %v913_v50 = vmul.f32 %v2611_v43, %v3042_v12 }
 0x962   :  { %v816_v60 = vmul.f32 %v2613_v47, %v3046_v17 }
 0x9c2   :  { %v916_v44 = vpop.permute.xlu1 %915 }
 0x9c3   :  { %v918_v45 = vmul.f32 %v2611_v43, %v916_v44 }
 0x9c5   :  { %920 = vrot.lane.b32.xlu1 %v918_v45, %s2770_s2  ;;  %v819_v48 = vpop.permute.xlu0 %818 }
 0x9c6   :  { %v821_v49 = vmul.f32 %v2613_v47, %v819_v48 }
 0x9c8   :  { %823 = vrot.lane.b32.xlu0 %v821_v49, %s2770_s2 }
 0xa37   :  { %v921_v52 = vpop.permute.xlu1 %920 }
 0xa38   :  { %v3080_v53 = vadd.f32 %v921_v52, %v913_v50  ;;  %v194_v50 = vadd.f32 %v2965_v56, %v2883_v16 }
 0xa3a   :  { %2614 = vtanh.f32 %v3080_v53  ;;  %v824_v55 = vpop.permute.xlu0 %823 }
 0xa3b   :  { %v3084_v61 = vadd.f32 %v824_v55, %v816_v60 }
 0xa3d   :  { %2616 = vtanh.f32 %v3084_v61 }
 0xa44   :  { %v2615_v62 = vpop.eup %2614 }
 0xa45   :  { %926 = vrot.lane.b32.xlu1 %v2615_v62, %s2769_s20 }
 0xa47   :  { %v2617_v2 = vpop.eup %2616 }
 0xa48   :  { %829 = vrot.lane.b32.xlu0 %v2617_v2, %s2769_s20 }
 0xab7   :  { %v927_v3 = vpop.permute.xlu1 %926 }
 0xab8   :  { %v929_v4 = vmul.f32 %v2611_v43, %v927_v3 }
 0xaba   :  { %931 = vrot.lane.b32.xlu0 %v929_v4, %s2770_s2  ;;  %v830_v5 = vpop.permute.xlu0 %829 }
 0xabb   :  { %v832_v6 = vmul.f32 %v2613_v47, %v830_v5 }
 0xabd   :  { %935 = vrot.lane.b32.xlu1 %v832_v6, %s2769_s20 }
 0xb2c   :  { %v932_v7 = vpop.permute.xlu0 %931 }
 0xb2d   :  { %2272 = vmatmul.mubr.msk.f32.vlgmr.msra.gmra.mrb[14].mxu0 %vm77_vm1, %v932_v7 }
 0xb2e   :  { %2482 = vmatpush3.bf16.msra.mxu0 %v2902_v36  ;;  %2290 = vmatprep.mubr.msk.f32.mxu0 %vm2767_vm0, %v2768_v1 }
 0xb2f   :  { %2483 = vmatprep.subr.bf16.mxu0 %v2766_v0  ;;  %v936_v8 = vpop.permute.xlu1 %935 }
 0xb30   :  { %v938_v10 = vsel %vm77_vm1, %v932_v7, %v936_v8 }
 0xb31   :  { %2261 = vmatmul.mubr.msk.f32.vlgmr.msra.gmra.mrb[8].mxu1 %vm329_vm2, %v938_v10 }
 0xb32   :  { %2485 = vmatpush3.bf16.msra.mxu0 %v2919_v41  ;;  %2494 = vmatpush3.bf16.msra.mxu1 %v2856_v9 }
 0xb33   :  { %2486 = vmatprep.subr.bf16.mxu0 %v2766_v0  ;;  %2495 = vmatprep.subr.bf16.mxu1 %v2766_v0 }
 0xb34   :  { %2301 = vmatprep.mubr.msk.f32.mxu1 %vm2767_vm0, %v2768_v1 }
 0xb36   :  { %2488 = vmatpush3.bf16.msra.mxu0 %v2937_v46  ;;  %2497 = vmatpush3.bf16.msra.mxu1 %v2863_v14 }
 0xb37   :  { %2489 = vmatprep.subr.bf16.mxu0 %v2766_v0  ;;  %2498 = vmatprep.subr.bf16.mxu1 %v2766_v0 }
 0xb3a   :  { %2491 = vmatpush3.bf16.msra.mxu0 %v2953_v51 }
 0xb3b   :  { %2510 = vmatprep.subr.bf16.mxu0 %v2766_v0 }
 0xc00   :  { %v1104_v12 = vpop.f32.mrb[14].mxu0 }
 0xc01   :  { %v1108_v13 = vadd.f32 %v1104_v12, %v189_v11  ;;  %v2273_v15 = vpop.f32.mrb[15].mxu0 }
 0xc03   :  { %2618 = vtanh.f32 %v1108_v13  ;;  %v1977_v22 = vmul.f32 -1.442695, %v1108_v13 }
 0xc04   :  { %v1008_v17 = vpop.f32.mrb[8].mxu1 }
 0xc05   :  { %v1009_v18 = vadd.f32 %v2997_v63, %v1008_v17  ;;  %v2262_v19 = vpop.f32.mrb[9].mxu1 }
 0xc07   :  { %2620 = vtanh.f32 %v1009_v18  ;;  %v1975_v23 = vmul.f32 -1.442695, %v1009_v18 }
 0xc08   :  { %2622 = vpow2.f32 %v1977_v22 }
 0xc09   :  { %2624 = vpow2.f32 %v1975_v23 }
 0xc0d   :  { %v2619_v20 = vpop.eup %2618 }
 0xc0e   :  { %1118 = vrot.lane.b32.xlu1 %v2619_v20, %s2769_s20 }
 0xc11   :  { %v2621_v21 = vpop.eup %2620 }
 0xc12   :  { %1021 = vrot.lane.b32.xlu0 %v2621_v21, %s2769_s20  ;;  %v2623_v57 = vpop.eup %2622 }
 0xc13   :  { %v1112_v24 = vadd.f32 1.0, %v2623_v57  ;;  %v2625_v25 = vpop.eup %2624 }
 0xc14   :  { %v1015_v26 = vadd.f32 1.0, %v2625_v25 }
 0xc15   :  { %2626 = vrcp.f32 %v1112_v24 }
 0xc16   :  { %2628 = vrcp.f32 %v1015_v26 }
 0xc1f   :  { %v2627_v27 = vpop.eup %2626 }
 0xc20   :  { %v2629_v30 = vpop.eup %2628  ;;  %v1116_v34 = vmul.f32 %v2627_v27, %v3080_v53 }
 0xc21   :  { %v1019_v37 = vmul.f32 %v2629_v30, %v3084_v61 }
 0xc80   :  { %v1119_v28 = vpop.permute.xlu1 %1118 }
 0xc81   :  { %v1121_v29 = vmul.f32 %v2627_v27, %v1119_v28 }
 0xc83   :  { %1123 = vrot.lane.b32.xlu1 %v1121_v29, %s2770_s2 }
 0xc84   :  { %v1022_v31 = vpop.permute.xlu0 %1021 }
 0xc85   :  { %v1024_v33 = vmul.f32 %v2629_v30, %v1022_v31 }
 0xc87   :  { %1026 = vrot.lane.b32.xlu0 %v1024_v33, %s2770_s2 }
 0xcf5   :  { %v1124_v35 = vpop.permute.xlu1 %1123 }
 0xcf6   :  { %v3118_v32 = vadd.f32 %v1124_v35, %v1116_v34 }
 0xcf8   :  { %2630 = vtanh.f32 %v3118_v32 }
 0xcf9   :  { %v1027_v38 = vpop.permute.xlu0 %1026 }
 0xcfa   :  { %v3122_v54 = vadd.f32 %v1027_v38, %v1019_v37 }
 0xcfc   :  { %2632 = vtanh.f32 %v3122_v54 }
 0xd02   :  { %v2631_v39 = vpop.eup %2630 }
 0xd03   :  { %1129 = vrot.lane.b32.xlu1 %v2631_v39, %s2769_s20 }
 0xd06   :  { %v2633_v40 = vpop.eup %2632 }
 0xd07   :  { %1032 = vrot.lane.b32.xlu0 %v2633_v40, %s2769_s20 }
 0xd75   :  { %v1130_v42 = vpop.permute.xlu1 %1129 }
 0xd76   :  { %v1132_v43 = vmul.f32 %v2627_v27, %v1130_v42 }
 0xd78   :  { %1134 = vrot.lane.b32.xlu0 %v1132_v43, %s2770_s2 }
 0xd79   :  { %v1033_v44 = vpop.permute.xlu0 %1032 }
 0xd7a   :  { %v1035_v45 = vmul.f32 %v2629_v30, %v1033_v44 }
 0xd7c   :  { %1138 = vrot.lane.b32.xlu1 %v1035_v45, %s2769_s20 }
 0xdea   :  { %v1135_v47 = vpop.permute.xlu0 %1134 }
 0xdeb   :  { %2302 = vmatmul.mubr.msk.f32.vlgmr.msra.gmra.mrb[10].mxu1 %vm77_vm1, %v1135_v47 }
 0xdec   :  { %2500 = vmatpush3.bf16.msra.mxu1 %v2902_v36  ;;  %2320 = vmatprep.mubr.msk.f32.mxu1 %vm2767_vm0, %v2768_v1 }
 0xded   :  { %2501 = vmatprep.subr.bf16.mxu1 %v2766_v0 }
 0xdee   :  { %v1139_v48 = vpop.permute.xlu1 %1138 }
 0xdef   :  { %v1141_v49 = vsel %vm77_vm1, %v1135_v47, %v1139_v48 }
 0xdf0   :  { %2503 = vmatpush3.bf16.msra.mxu1 %v2919_v41  ;;  %2291 = vmatmul.mubr.msk.f32.vlgmr.msra.gmra.mrb[16].mxu0 %vm329_vm2, %v1141_v49 }
 0xdf1   :  { %2504 = vmatprep.subr.bf16.mxu1 %v2766_v0  ;;  %2512 = vmatpush3.bf16.msra.mxu0 %v2856_v9 }
 0xdf2   :  { %2331 = vmatprep.mubr.msk.f32.mxu0 %vm2767_vm0, %v2768_v1  ;;  %2513 = vmatprep.subr.bf16.mxu0 %v2766_v0 }
 0xdf4   :  { %2506 = vmatpush3.bf16.msra.mxu1 %v2937_v46 }
 0xdf5   :  { %2507 = vmatprep.subr.bf16.mxu1 %v2766_v0  ;;  %2515 = vmatpush3.bf16.msra.mxu0 %v2863_v14 }
 0xdf6   :  { %2516 = vmatprep.subr.bf16.mxu0 %v2766_v0 }
 0xdf8   :  { %2509 = vmatpush3.bf16.msra.mxu1 %v2953_v51 }
 0xdf9   :  { %2528 = vmatprep.subr.bf16.mxu1 %v2766_v0 }
 0xebe   :  { %v1307_v52 = vpop.f32.mrb[10].mxu1 }
 0xebf   :  { %v1311_v53 = vadd.f32 %v1307_v52, %v194_v50  ;;  %v2303_v60 = vpop.f32.mrb[11].mxu1 }
 0xec1   :  { %2634 = vtanh.f32 %v1311_v53  ;;  %v1981_v4 = vmul.f32 -1.442695, %v1311_v53 }
 0xec3   :  { %v1211_v55 = vpop.f32.mrb[16].mxu0 }
 0xec4   :  { %v1212_v61 = vadd.f32 %v2997_v63, %v1211_v55  ;;  %v2292_v62 = vpop.f32.mrb[17].mxu0 }
 0xec6   :  { %2636 = vtanh.f32 %v1212_v61  ;;  %v1979_v5 = vmul.f32 -1.442695, %v1212_v61 }
 0xec7   :  { %2638 = vpow2.f32 %v1981_v4 }
 0xec8   :  { %2640 = vpow2.f32 %v1979_v5 }
 0xecb   :  { %v2635_v2 = vpop.eup %2634 }
 0xecc   :  { %1321 = vrot.lane.b32.xlu1 %v2635_v2, %s2769_s20 }
 0xed0   :  { %v2637_v3 = vpop.eup %2636 }
 0xed1   :  { %1224 = vrot.lane.b32.xlu0 %v2637_v3, %s2769_s20  ;;  %v2639_v56 = vpop.eup %2638 }
 0xed2   :  { %v1315_v6 = vadd.f32 1.0, %v2639_v56  ;;  %v2641_v7 = vpop.eup %2640 }
 0xed3   :  { %v1218_v8 = vadd.f32 1.0, %v2641_v7 }
 0xed4   :  { %2642 = vrcp.f32 %v1315_v6 }
 0xed5   :  { %2644 = vrcp.f32 %v1218_v8 }
 0xede   :  { %v2643_v10 = vpop.eup %2642 }
 0xedf   :  { %v2645_v13 = vpop.eup %2644  ;;  %v1319_v18 = vmul.f32 %v2643_v10, %v3118_v32 }
 0xee0   :  { %v1222_v21 = vmul.f32 %v2645_v13, %v3122_v54 }
 0xf3e   :  { %v1322_v11 = vpop.permute.xlu1 %1321 }
 0xf3f   :  { %v1324_v12 = vmul.f32 %v2643_v10, %v1322_v11 }
 0xf41   :  { %1326 = vrot.lane.b32.xlu1 %v1324_v12, %s2770_s2 }
 0xf43   :  { %v1225_v15 = vpop.permute.xlu0 %1224 }
 0xf44   :  { %v1227_v17 = vmul.f32 %v2645_v13, %v1225_v15 }
 0xf46   :  { %1229 = vrot.lane.b32.xlu0 %v1227_v17, %s2770_s2 }
 0xfb3   :  { %v1327_v19 = vpop.permute.xlu1 %1326 }
 0xfb4   :  { %v3156_v20 = vadd.f32 %v1327_v19, %v1319_v18 }
 0xfb6   :  { %2646 = vtanh.f32 %v3156_v20 }
 0xfb8   :  { %v1230_v22 = vpop.permute.xlu0 %1229 }
 0xfb9   :  { %v3160_v23 = vadd.f32 %v1230_v22, %v1222_v21 }
 0xfbb   :  { %2648 = vtanh.f32 %v3160_v23 }
 0xfc0   :  { %v2647_v57 = vpop.eup %2646 }
 0xfc1   :  { %1332 = vrot.lane.b32.xlu1 %v2647_v57, %s2769_s20 }
 0xfc5   :  { %v2649_v24 = vpop.eup %2648 }
 0xfc6   :  { %1235 = vrot.lane.b32.xlu0 %v2649_v24, %s2769_s20 }
0x1033   :  { %v1333_v25 = vpop.permute.xlu1 %1332 }
0x1034   :  { %v1335_v26 = vmul.f32 %v2643_v10, %v1333_v25 }
0x1036   :  { %1337 = vrot.lane.b32.xlu0 %v1335_v26, %s2770_s2 }
0x1038   :  { %v1236_v27 = vpop.permute.xlu0 %1235 }
0x1039   :  { %v1238_v28 = vmul.f32 %v2645_v13, %v1236_v27 }
0x103b   :  { %1341 = vrot.lane.b32.xlu1 %v1238_v28, %s2769_s20 }
0x10a8   :  { %v1338_v29 = vpop.permute.xlu0 %1337 }
0x10a9   :  { %2332 = vmatmul.mubr.msk.f32.vlgmr.msra.gmra.mrb[18].mxu0 %vm77_vm1, %v1338_v29 }
0x10aa   :  { %2518 = vmatpush3.bf16.msra.mxu0 %v2902_v36  ;;  %2350 = vmatprep.mubr.msk.f32.mxu0 %vm2767_vm0, %v2768_v1 }
0x10ab   :  { %2519 = vmatprep.subr.bf16.mxu0 %v2766_v0 }
0x10ad   :  { %v1342_v30 = vpop.permute.xlu1 %1341 }
0x10ae   :  { %2521 = vmatpush3.bf16.msra.mxu0 %v2919_v41  ;;  %v1344_v31 = vsel %vm77_vm1, %v1338_v29, %v1342_v30 }
0x10af   :  { %2522 = vmatprep.subr.bf16.mxu0 %v2766_v0  ;;  %2321 = vmatmul.mubr.msk.f32.vlgmr.msra.gmra.mrb[12].mxu1 %vm329_vm2, %v1344_v31 }
0x10b0   :  { %2530 = vmatpush3.bf16.msra.mxu1 %v2856_v9  ;;  %2361 = vmatprep.mubr.msk.f32.mxu1 %vm2767_vm0, %v2768_v1  ;;  %v199_v9 = vadd.f32 %v2883_v16, %v2971_v59 }
0x10b1   :  { %2531 = vmatprep.subr.bf16.mxu1 %v2766_v0 }
0x10b2   :  { %2524 = vmatpush3.bf16.msra.mxu0 %v2937_v46 }
0x10b3   :  { %2525 = vmatprep.subr.bf16.mxu0 %v2766_v0 }
0x10b4   :  { %2533 = vmatpush3.bf16.msra.mxu1 %v2863_v14 }
0x10b5   :  { %2534 = vmatprep.subr.bf16.mxu1 %v2766_v0 }
0x10b6   :  { %2527 = vmatpush3.bf16.msra.mxu0 %v2953_v51 }
0x10b7   :  { %2546 = vmatprep.subr.bf16.mxu0 %v2766_v0 }
0x117c   :  { %v1510_v33 = vpop.f32.mrb[18].mxu0 }
0x117d   :  { %v1514_v34 = vadd.f32 %v1510_v33, %v199_v9  ;;  %v2333_v35 = vpop.f32.mrb[19].mxu0 }
0x117f   :  { %2650 = vtanh.f32 %v1514_v34  ;;  %v1985_v39 = vmul.f32 -1.442695, %v1514_v34 }
0x1182   :  { %v1414_v32 = vpop.f32.mrb[12].mxu1 }
0x1183   :  { %v1415_v37 = vadd.f32 %v2997_v63, %v1414_v32  ;;  %v2322_v38 = vpop.f32.mrb[13].mxu1 }
0x1185   :  { %2652 = vtanh.f32 %v1415_v37  ;;  %v1983_v40 = vmul.f32 -1.442695, %v1415_v37 }
0x1186   :  { %2654 = vpow2.f32 %v1985_v39 }
0x1187   :  { %2656 = vpow2.f32 %v1983_v40 }
0x1189   :  { %v2651_v54 = vpop.eup %2650 }
0x118a   :  { %1524 = vrot.lane.b32.xlu1 %v2651_v54, %s2769_s20 }
0x118f   :  { %v2653_v14 = vpop.eup %2652 }
0x1190   :  { %1427 = vrot.lane.b32.xlu0 %v2653_v14, %s2769_s20  ;;  %v2655_v59 = vpop.eup %2654 }
0x1191   :  { %v1518_v42 = vadd.f32 1.0, %v2655_v59  ;;  %v2657_v43 = vpop.eup %2656 }
0x1192   :  { %v1421_v44 = vadd.f32 1.0, %v2657_v43 }
0x1193   :  { %2658 = vrcp.f32 %v1518_v42 }
0x1194   :  { %2660 = vrcp.f32 %v1421_v44 }
0x119d   :  { %v2659_v45 = vpop.eup %2658 }
0x119e   :  { %v2661_v49 = vpop.eup %2660  ;;  %v1522_v53 = vmul.f32 %v2659_v45, %v3156_v20 }
0x119f   :  { %v1425_v61 = vmul.f32 %v2661_v49, %v3160_v23 }
0x11fc   :  { %v1525_v47 = vpop.permute.xlu1 %1524 }
0x11fd   :  { %v1527_v48 = vmul.f32 %v2659_v45, %v1525_v47 }
0x11ff   :  { %1529 = vrot.lane.b32.xlu1 %v1527_v48, %s2770_s2 }
0x1202   :  { %v1428_v50 = vpop.permute.xlu0 %1427 }
0x1203   :  { %v1430_v52 = vmul.f32 %v2661_v49, %v1428_v50 }
0x1205   :  { %1432 = vrot.lane.b32.xlu0 %v1430_v52, %s2770_s2 }
0x1271   :  { %v1530_v60 = vpop.permute.xlu1 %1529 }
0x1272   :  { %v1532_v55 = vadd.f32 %v1530_v60, %v1522_v53 }
0x1274   :  { %2662 = vtanh.f32 %v1532_v55 }
0x1277   :  { %v1433_v62 = vpop.permute.xlu0 %1432 }
0x1278   :  { %v1435_v2 = vadd.f32 %v1433_v62, %v1425_v61  ;;  %v1850_v61 = vld [vmem:[#allocation5 + $0x10] sm:$0xff] }
0x127a   :  { %2664 = vtanh.f32 %v1435_v2 }
0x127e   :  { %v2663_v3 = vpop.eup %2662 }
0x127f   :  { %1535 = vrot.lane.b32.xlu1 %v2663_v3, %s2769_s20 }
0x1284   :  { %v2665_v4 = vpop.eup %2664 }
0x1285   :  { %1438 = vrot.lane.b32.xlu0 %v2665_v4, %s2769_s20 }
0x12f1   :  { %v1536_v5 = vpop.permute.xlu1 %1535 }
0x12f2   :  { %v1538_v56 = vmul.f32 %v2659_v45, %v1536_v5 }
0x12f4   :  { %1540 = vrot.lane.b32.xlu0 %v1538_v56, %s2770_s2 }
0x12f7   :  { %v1439_v6 = vpop.permute.xlu0 %1438 }
0x12f8   :  { %v1441_v7 = vmul.f32 %v2661_v49, %v1439_v6 }
0x12fa   :  { %1544 = vrot.lane.b32.xlu1 %v1441_v7, %s2769_s20  ;;  %v1992_v7 = vld [vmem:[%s3255_s7] ss:$0 sm:$0xff] }
0x1366   :  { %v1541_v8 = vpop.permute.xlu0 %1540 }
0x1367   :  { %2362 = vmatmul.mubr.msk.f32.vlgmr.msra.gmra.mrb[14].mxu1 %vm77_vm1, %v1541_v8 }
0x1368   :  { %2536 = vmatpush3.bf16.msra.mxu1 %v2902_v36  ;;  %2380 = vmatprep.mubr.msk.f32.mxu1 %vm2767_vm0, %v2768_v1  ;;  %v204_v36 = vadd.f32 %v2969_v58, %v2883_v16 }
0x1369   :  { %2537 = vmatprep.subr.bf16.mxu1 %v2766_v0 }
0x136c   :  { %2539 = vmatpush3.bf16.msra.mxu1 %v2919_v41  ;;  %v1545_v10 = vpop.permute.xlu1 %1544 }
0x136d   :  { %2540 = vmatprep.subr.bf16.mxu1 %v2766_v0  ;;  %v1547_v11 = vsel %vm77_vm1, %v1541_v8, %v1545_v10 }
0x136e   :  { %2351 = vmatmul.mubr.msk.f32.vlgmr.msra.gmra.mrb[20].mxu0 %vm329_vm2, %v1547_v11 }
0x136f   :  { %2391 = vmatprep.mubr.msk.f32.mxu0 %vm2767_vm0, %v2768_v1 }
0x1370   :  { %2542 = vmatpush3.bf16.msra.mxu1 %v2937_v46 }
0x1371   :  { %2543 = vmatprep.subr.bf16.mxu1 %v2766_v0 }
0x1374   :  { %2545 = vmatpush3.bf16.msra.mxu1 %v2953_v51 }
0x143a   :  { %v1713_v41 = vpop.f32.mrb[14].mxu1 }
0x143b   :  { %v1717_v12 = vadd.f32 %v1713_v41, %v204_v36  ;;  %v2363_v13 = vpop.f32.mrb[15].mxu1 }
0x143d   :  { %2666 = vtanh.f32 %v1717_v12  ;;  %v1989_v19 = vmul.f32 -1.442695, %v1717_v12 }
0x1441   :  { %v1617_v15 = vpop.f32.mrb[20].mxu0 }
0x1442   :  { %v1618_v17 = vadd.f32 %v2997_v63, %v1617_v15  ;;  %v2352_v18 = vpop.f32.mrb[21].mxu0 }
0x1444   :  { %2668 = vtanh.f32 %v1618_v17  ;;  %v1987_v51 = vmul.f32 -1.442695, %v1618_v17 }
0x1445   :  { %2670 = vpow2.f32 %v1989_v19 }
0x1446   :  { %2672 = vpow2.f32 %v1987_v51 }
0x1447   :  { %v2667_v46 = vpop.eup %2666 }
0x1448   :  { %1727 = vrot.lane.b32.xlu1 %v2667_v46, %s2769_s20 }
0x144e   :  { %v2669_v1 = vpop.eup %2668 }
0x144f   :  { %1630 = vrot.lane.b32.xlu0 %v2669_v1, %s2769_s20  ;;  %v2671_v16 = vpop.eup %2670 }
0x1450   :  { %v1721_v58 = vadd.f32 1.0, %v2671_v16  ;;  %v2673_v20 = vpop.eup %2672 }
0x1451   :  { %v1624_v21 = vadd.f32 1.0, %v2673_v20 }
0x1452   :  { %2674 = vrcp.f32 %v1721_v58 }
0x1453   :  { %2676 = vrcp.f32 %v1624_v21 }
0x145c   :  { %v2675_v22 = vpop.eup %2674 }
0x145d   :  { %v2677_v24 = vpop.eup %2676  ;;  %v1725_v27 = vmul.f32 %v2675_v22, %v1532_v55  ;;  %v1849_v55 = vld [vmem:[#allocation5 + $0x8] sm:$0xff] }
0x145e   :  { %v1628_v30 = vmul.f32 %v2677_v24, %v1435_v2  ;;  %v1851_v2 = vld [vmem:[#allocation5 + $0x18] sm:$0xff] }
0x145f   :  { %v2550_v3 = vpack.c.bf16 %v1851_v2, %v1850_v61 }
0x14ba   :  { %v1728_v23 = vpop.permute.xlu1 %1727 }
0x14bb   :  { %v1730_v57 = vmul.f32 %v2675_v22, %v1728_v23 }
0x14bd   :  { %1732 = vrot.lane.b32.xlu1 %v1730_v57, %s2770_s2 }
0x14c1   :  { %v1631_v25 = vpop.permute.xlu0 %1630 }
0x14c2   :  { %v1633_v26 = vmul.f32 %v2677_v24, %v1631_v25 }
0x14c4   :  { %1635 = vrot.lane.b32.xlu0 %v1633_v26, %s2770_s2 }
0x152f   :  { %v1733_v28 = vpop.permute.xlu1 %1732 }
0x1530   :  { %v1735_v29 = vadd.f32 %v1733_v28, %v1725_v27 }
0x1532   :  { %2678 = vtanh.f32 %v1735_v29 }
0x1536   :  { %v1636_v31 = vpop.permute.xlu0 %1635 }
0x1537   :  { %v1638_v9 = vadd.f32 %v1636_v31, %v1628_v30 }
0x1539   :  { %2680 = vtanh.f32 %v1638_v9 }
0x153c   :  { %v2679_v33 = vpop.eup %2678 }
0x153d   :  { %1738 = vrot.lane.b32.xlu1 %v2679_v33, %s2769_s20 }
0x1543   :  { %v2681_v34 = vpop.eup %2680 }
0x1544   :  { %1641 = vrot.lane.b32.xlu0 %v2681_v34, %s2769_s20 }
0x15af   :  { %v1739_v35 = vpop.permute.xlu1 %1738 }
0x15b0   :  { %v1741_v32 = vmul.f32 %v2675_v22, %v1739_v35 }
0x15b2   :  { %1743 = vrot.lane.b32.xlu0 %v1741_v32, %s2770_s2 }
0x15b6   :  { %v1642_v37 = vpop.permute.xlu0 %1641 }
0x15b7   :  { %v1644_v38 = vmul.f32 %v2677_v24, %v1642_v37 }
0x15b9   :  { %1747 = vrot.lane.b32.xlu1 %v1644_v38, %s2769_s20 }
0x1624   :  { %v1744_v54 = vpop.permute.xlu0 %1743 }
0x162b   :  { %v1748_v14 = vpop.permute.xlu1 %1747 }
0x162c   :  { %v1750_v39 = vsel %vm77_vm1, %v1744_v54, %v1748_v14 }
0x162d   :  { %2381 = vmatmul.mubr.msk.f32.vlgmr.msra.gmra.mrb[16].mxu1 %vm329_vm2, %v1750_v39 }
0x1700   :  { %v1820_v40 = vpop.f32.mrb[16].mxu1 }
0x1701   :  { %v1821_v59 = vadd.f32 %v2997_v63, %v1820_v40  ;;  %v2382_v42 = vpop.f32.mrb[17].mxu1  ;;  %v1848_v63 = vld [vmem:[#allocation5] sm:$0xff] }
0x1702   :  { %v2547_v62 = vpack.c.bf16 %v1849_v55, %v1848_v63 }
0x1703   :  { %2682 = vtanh.f32 %v1821_v59  ;;  %v1991_v44 = vmul.f32 -1.442695, %v1821_v59 }
0x1704   :  { %2548 = vmatpush3.bf16.msra.mxu0 %v2547_v62 }
0x1705   :  { %2684 = vpow2.f32 %v1991_v44  ;;  %2549 = vmatprep.subr.bf16.mxu0 %v2766_v0 }
0x1708   :  { %2551 = vmatpush3.bf16.msra.mxu0 %v2550_v3 }
0x170d   :  { %v2683_v43 = vpop.eup %2682 }
0x170e   :  { %1833 = vrot.lane.b32.xlu0 %v2683_v43, %s2769_s20 }
0x170f   :  { %v2685_v45 = vpop.eup %2684 }
0x1710   :  { %v1827_v47 = vadd.f32 1.0, %v2685_v45 }
0x1712   :  { %2686 = vrcp.f32 %v1827_v47 }
0x171c   :  { %v2687_v48 = vpop.eup %2686 }
0x171d   :  { %v1831_v52 = vmul.f32 %v2687_v48, %v1638_v9 }
0x1780   :  { %v1834_v49 = vpop.permute.xlu0 %1833 }
0x1781   :  { %v1836_v50 = vmul.f32 %v2687_v48, %v1834_v49 }
0x1783   :  { %1838 = vrot.lane.b32.xlu1 %v1836_v50, %s2770_s2 }
0x17f5   :  { %v1839_v53 = vpop.permute.xlu1 %1838 }
0x17f6   :  { %v1841_v60 = vadd.f32 %v1839_v53, %v1831_v52 }
0x17f8   :  { %2688 = vtanh.f32 %v1841_v60 }
0x1802   :  { %v2689_v4 = vpop.eup %2688 }
0x1803   :  { %1844 = vrot.lane.b32.xlu0 %v2689_v4, %s2769_s20 }
0x1875   :  { %v1845_v5 = vpop.permute.xlu0 %1844 }
0x1876   :  { %v1847_v56 = vmul.f32 %v2687_v48, %v1845_v5 }
0x1878   :  { %1860 = vrot.lane.b32.xlu1 %v1847_v56, %s2770_s2 }
0x18ea   :  { %v1861_v6 = vpop.permute.xlu1 %1860 }
0x18eb   :  { %2392 = vmatmul.mubr.msk.f32.vlgmr.msra.gmra.mrb[22].mxu0 %vm77_vm1, %v1861_v6 }
0x19be   :  { %v1930_v8 = vpop.f32.mrb[22].mxu0 }
0x19bf   :  { %v1931_v10 = vadd.f32 %v1992_v7, %v1930_v8  ;;  %v2393_v0 = vpop.f32.mrb[23].mxu0 }
0x19c1   :  { %1934 = vst [vmem:[#allocation7] sm:$0xff] %v1931_v10 }
0x19c2   :  { %2745 = shalt.err (!%p2742_p6)
}
0x19c3   :  { %s2746_s3 = scalar_lea.hbm %s3256_s8, 128 }
0x19c4   :  { %p2747_p7 = scmp.ne.s32.totalorder %s3256_s8, %s2746_s3  ;;  %p2750_p8 = scmp.lt.u32.totalorder %s2746_s3, %s3256_s8 }
0x19c6   :  { %p2752_p9 = pnand %p2750_p8, %p2747_p7 }
0x19c8   :  { %2755 = shalt.err (!%p2752_p9)
}
0x19c9   :  { %1944 = dma.vmem_to_hbm [thread:$0]  %s1942_s27, 128, %s3256_s8, [#allocation4]  }
0x19ca   :  { %2760 = dma.done.wait [#allocation4], 128  }
0x19cb   :  { %2761 = vsyncadd [#allocation4], 4294967168 }
0x19cc   :  { %1948 = vsyncpa [#allocation3], 1 }
0x19cd   :  { %1949 = vsyncpa [#allocation6], 1 }
0x19ce   :  { %1950 = vsyncpa [#allocation4], 1 }

</bundles_post_ra>
